<compile_context>
chip_gen: v7x
topology: tpu7x:2x2x1
jax: 0.10.0
libtpu: 0.0.40
codegen_flags: <defaults>
</compile_context>

<pallas_src>
import functools

import jax
import jax.numpy as jnp
from jax.experimental import pallas as pl
from jax.experimental.pallas import tpu as pltpu

F_L96 = 8.0     # TODO(synk): standard Lorenz-96 forcing used by the repo's L96 ode_func
LN_EPS = 1e-5   # PyTorch LayerNorm default
LEAK = 0.01     # PyTorch LeakyReLU default
DT = 0.05       # odeint options={'step_size': 0.05}
N_STEPS = 2     # interval [0.0, 0.1] -> 2 fixed RK4 steps


# ----------------------------------------------------------------------------
# Kernel
# ----------------------------------------------------------------------------
def _enaf_fused_kernel(m, n_i, n_o, n_h,
                       os_ref, state_ref, mem_ref,
                       w1os_ref, w1v_ref, w1m_ref, b1_ref, g1_ref, be1_ref,
                       w2_ref, b2_ref, g2_ref, be2_ref,
                       w3adj_ref, b3adj_ref, w3xm_ref, b3xm_ref,
                       w3f_ref, b3f_ref, w3mc_ref, b3mc_ref,
                       s1_ref, s2_ref,
                       ens_ref, statefwd_ref, memout_ref):
    f32 = jnp.float32
    bf16 = jnp.bfloat16
    bt = state_ref.shape[0]            # batch rows in this grid block
    R = bt * m                          # ensemble rows in this grid block
    two_nh = 2 * n_h

    state3 = state_ref[...]                                       # (bt, m, n_o) f32
    # torch.var_mean(state, dim=1, keepdim=True) -- unbiased variance
    mean = jnp.mean(state3, axis=1, keepdims=True)                 # (bt, 1, n_o)
    var = jnp.sum((state3 - mean) ** 2, axis=1, keepdims=True) * (1.0 / (m - 1))

    state = state3.reshape(R, n_o)                                 # f32
    obs_state = os_ref[...].reshape(R, n_i + n_o)                  # bf16 (MXU operand)
    memory = mem_ref[...].reshape(R, n_h)                          # f32

    # --- fused first Linear: the c_in concat is folded into row-split weights,
    #     and lin_net/sig_net are lane-stacked into 2*n_h output columns.
    h = jnp.dot(obs_state, w1os_ref[...], preferred_element_type=f32)
    h = h + jnp.dot(memory.astype(bf16), w1m_ref[...], preferred_element_type=f32)
    var_rows = jnp.broadcast_to(var, (bt, m, n_o)).reshape(R, n_o)  # per-member repeat
    h = h + jnp.dot(var_rows.astype(bf16), w1v_ref[...], preferred_element_type=f32)
    h = h + b1_ref[...]

    # lane mask selecting the sig-net half (lanes [n_h, 2*n_h))
    lane = jax.lax.broadcasted_iota(jnp.int32, (R, two_nh), 1)
    hi = lane >= n_h

    def half_layernorm(x, gamma, beta):
        # LayerNorm(eps=1e-5) applied independently to the lin / sig halves.
        xl = jnp.where(hi, 0.0, x)
        xh = jnp.where(hi, x, 0.0)
        mu = jnp.where(hi,
                       jnp.sum(xh, -1, keepdims=True),
                       jnp.sum(xl, -1, keepdims=True)) * (1.0 / n_h)
        d = x - mu
        dl = jnp.where(hi, 0.0, d)
        dh = jnp.where(hi, d, 0.0)
        v = jnp.where(hi,
                      jnp.sum(dh * dh, -1, keepdims=True),
                      jnp.sum(dl * dl, -1, keepdims=True)) * (1.0 / n_h)
        return d * jax.lax.rsqrt(v + LN_EPS) * gamma + beta

    def leaky(x):
        return jnp.maximum(x, LEAK * x)

    # Dropout is identity in eval mode.
    h = leaky(half_layernorm(h, g1_ref[...], be1_ref[...]))
    h = jnp.dot(h.astype(bf16), w2_ref[...], preferred_element_type=f32) + b2_ref[...]
    h = leaky(half_layernorm(h, g2_ref[...], be2_ref[...]))
    hb = h.astype(bf16)

    # Final Linear: split([n_o, n_h]) + net selection folded into zero-padded weights.
    adj = jnp.dot(hb, w3adj_ref[...], preferred_element_type=f32) + b3adj_ref[...]
    x_mem = jnp.dot(hb, w3xm_ref[...], preferred_element_type=f32) + b3xm_ref[...]
    filt = jax.nn.sigmoid(
        jnp.dot(hb, w3f_ref[...], preferred_element_type=f32) + b3f_ref[...])
    mem_clear = jax.nn.sigmoid(
        jnp.dot(hb, w3mc_ref[...], preferred_element_type=f32) + b3mc_ref[...])

    memout_ref[...] = (mem_clear * memory + x_mem).reshape(bt, m, n_h)

    x = filt * state + adj                                          # analysis ensemble

    # Lorenz-96 tendency via exact f32 stencil matmuls:
    #   (y @ s1)[:, i] = y[:, i+1] - y[:, i-2]   (periodic)
    #   (y @ s2)[:, i] = y[:, i-1]
    s1 = s1_ref[...]
    s2 = s2_ref[...]

    def tendency(y):
        diff = jnp.dot(y, s1, preferred_element_type=f32)
        y_m1 = jnp.dot(y, s2, preferred_element_type=f32)
        return diff * y_m1 - y + F_L96

    # torchdiffeq fixed-grid RK4 (3/8-rule step), 2 steps of dt=0.05 over [0, 0.1].
    y = x
    for _ in range(N_STEPS):
        k1 = tendency(y)
        k2 = tendency(y + DT * k1 * (1.0 / 3.0))
        k3 = tendency(y + DT * (k2 - k1 * (1.0 / 3.0)))
        k4 = tendency(y + DT * (k1 - k2 + k3))
        y = y + DT * 0.125 * (k1 + 3.0 * (k2 + k3) + k4)

    ens_ref[...] = x.reshape(bt, m, n_o)
    statefwd_ref[...] = y.reshape(bt, m, n_o)


# ----------------------------------------------------------------------------
# Wrapper
# ----------------------------------------------------------------------------
def _pick_batch_tile(batch, m):
    """Batch tile: big enough rows per block, >=2 blocks so v7x uses both TCs."""
    bt = max(1, min(batch, 256 // max(m, 1)))
    if bt >= batch and batch > 1:
        bt = max(1, batch // 2)
    while batch % bt:
        bt -= 1
    return bt


def enaf_forward(fused_params, observation, state, memory):
    """observation: (B, m, n_i); state: (B, m, n_o); memory: (B*m, n_h)."""
    B, m, n_o = state.shape
    n_i = observation.shape[-1]
    n_h = memory.shape[-1]
    if m < 2:
        raise ValueError("EnAF requires ensemble size m >= 2 (unbiased variance).")

    # Layout plumbing outside the kernel: [obs|state] lane concat, bf16 MXU operand.
    obs_state = jnp.concatenate(
        [observation.astype(jnp.float32), state.astype(jnp.float32)], axis=-1
    ).astype(jnp.bfloat16)                                  # (B, m, n_i + n_o)
    state3 = state.astype(jnp.float32)                      # (B, m, n_o)
    mem3 = memory.astype(jnp.float32).reshape(B, m, n_h)    # (B, m, n_h)

    bt = _pick_batch_tile(B, m)
    grid = (B // bt,)

    def data_spec(shape):
        return pl.BlockSpec((bt,) + tuple(shape[1:]), lambda b: (b, 0, 0))

    def full_spec(arr):   # all fused params are 2-D
        return pl.BlockSpec(arr.shape, lambda b: (0, 0))

    inputs = (obs_state, state3, mem3) + tuple(fused_params)
    in_specs = ([data_spec(obs_state.shape), data_spec(state3.shape), data_spec(mem3.shape)]
                + [full_spec(p) for p in fused_params])
    out_shape = (
        jax.ShapeDtypeStruct((B, m, n_o), jnp.float32),     # ens (analysis ensemble)
        jax.ShapeDtypeStruct((B, m, n_o), jnp.float32),     # state pushed forward
        jax.ShapeDtypeStruct((B, m, n_h), jnp.float32),     # memory
    )
    out_specs = (data_spec((B, m, n_o)), data_spec((B, m, n_o)), data_spec((B, m, n_h)))

    kernel = functools.partial(_enaf_fused_kernel, m, n_i, n_o, n_h)
    ens, state_next, mem_out = pl.pallas_call(
        kernel,
        grid=grid,
        in_specs=in_specs,
        out_specs=out_specs,
        out_shape=out_shape,
        compiler_params=pltpu.CompilerParams(dimension_semantics=("parallel",)),
    )(*inputs)

    analysis = jnp.mean(ens, axis=1)                        # tiny; done in the wrapper
    return analysis, state_next, ens, mem_out.reshape(B * m, n_h)


# ----------------------------------------------------------------------------
# Parameters (PyTorch-equivalent raw params + kernel-ready fused params)
# ----------------------------------------------------------------------------
def init_enaf_params(key, n_i, n_o, n_h):
    """Synthetic init matching nn.Linear / nn.LayerNorm defaults (per net)."""
    d_in = n_i + 2 * n_o + n_h
    d_out = n_o + n_h

    def linear(k, fan_in, fan_out):
        kw, kb = jax.random.split(k)
        bound = fan_in ** -0.5
        W = jax.random.uniform(kw, (fan_in, fan_out), jnp.float32, -bound, bound)
        b = jax.random.uniform(kb, (fan_out,), jnp.float32, -bound, bound)
        return W, b

    keys = jax.random.split(key, 6)
    ones = jnp.ones((n_h,), jnp.float32)
    zeros = jnp.zeros((n_h,), jnp.float32)
    nets = []
    for i in range(2):  # 0 = lin_net, 1 = sig_net
        W1, b1 = linear(keys[3 * i + 0], d_in, n_h)
        W2, b2 = linear(keys[3 * i + 1], n_h, n_h)
        W3, b3 = linear(keys[3 * i + 2], n_h, d_out)
        nets.append((W1, b1, ones, zeros, W2, b2, ones, zeros, W3, b3))
    return tuple(nets)


def fuse_enaf_params(raw, n_i, n_o, n_h):
    """Lane-stack lin/sig nets, fold the input concat & output split into weights."""
    lin, sig = raw
    W1l, b1l, g1l, be1l, W2l, b2l, g2l, be2l, W3l, b3l = lin
    W1s, b1s, g1s, be1s, W2s, b2s, g2s, be2s, W3s, b3s = sig
    bf16 = jnp.bfloat16
    d_os = n_i + n_o

    def catl(a, b):
        return jnp.concatenate([a, b], axis=-1)

    w1_os = catl(W1l[:d_os], W1s[:d_os]).astype(bf16)                      # (n_i+n_o, 2nh)
    w1_v = catl(W1l[d_os:d_os + n_o], W1s[d_os:d_os + n_o]).astype(bf16)   # (n_o, 2nh)
    w1_m = catl(W1l[d_os + n_o:], W1s[d_os + n_o:]).astype(bf16)           # (n_h, 2nh)
    b1 = catl(b1l, b1s)[None, :]
    g1 = catl(g1l, g1s)[None, :]
    be1 = catl(be1l, be1s)[None, :]

    z_hh = jnp.zeros((n_h, n_h), jnp.float32)
    w2 = jnp.concatenate(
        [jnp.concatenate([W2l, z_hh], axis=1),
         jnp.concatenate([z_hh, W2s], axis=1)], axis=0).astype(bf16)       # (2nh, 2nh)
    b2 = catl(b2l, b2s)[None, :]
    g2 = catl(g2l, g2s)[None, :]
    be2 = catl(be2l, be2s)[None, :]

    z_ho = jnp.zeros((n_h, n_o), jnp.float32)
    w3_adj = jnp.concatenate([W3l[:, :n_o], z_ho], axis=0).astype(bf16)    # (2nh, n_o)
    w3_xm = jnp.concatenate([W3l[:, n_o:], z_hh], axis=0).astype(bf16)     # (2nh, n_h)
    w3_f = jnp.concatenate([z_ho, W3s[:, :n_o]], axis=0).astype(bf16)      # (2nh, n_o)
    w3_mc = jnp.concatenate([z_hh, W3s[:, n_o:]], axis=0).astype(bf16)     # (2nh, n_h)
    b3_adj = b3l[None, :n_o]
    b3_xm = b3l[None, n_o:]
    b3_f = b3s[None, :n_o]
    b3_mc = b3s[None, n_o:]

    # L96 stencil matrices: (y @ s1)[:, i] = y[:, i+1] - y[:, i-2]; (y @ s2)[:, i] = y[:, i-1]
    idx = jnp.arange(n_o)
    p_p1 = jnp.zeros((n_o, n_o), jnp.float32).at[(idx + 1) % n_o, idx].set(1.0)
    p_m2 = jnp.zeros((n_o, n_o), jnp.float32).at[(idx - 2) % n_o, idx].set(1.0)
    p_m1 = jnp.zeros((n_o, n_o), jnp.float32).at[(idx - 1) % n_o, idx].set(1.0)
    s1 = p_p1 - p_m2
    s2 = p_m1

    return (w1_os, w1_v, w1_m, b1, g1, be1, w2, b2, g2, be2,
            w3_adj, b3_adj, w3_xm, b3_xm, w3_f, b3_f, w3_mc, b3_mc, s1, s2)


# ----------------------------------------------------------------------------
# Pure-JAX f32 reference of the PyTorch forward (eval mode) for validation.
# ----------------------------------------------------------------------------
def enaf_reference(raw_params, observation, state, memory):
    lin, sig = raw_params
    B, m, n_o = state.shape
    n_i = observation.shape[-1]
    mean = jnp.mean(state, axis=1, keepdims=True)
    var = jnp.sum((state - mean) ** 2, axis=1, keepdims=True) / (m - 1)
    st = state.reshape(-1, n_o)
    sv = jnp.broadcast_to(var, (B, m, n_o)).reshape(-1, n_o)
    ob = observation.reshape(-1, n_i)
    c_in = jnp.concatenate([ob, st, sv, memory], axis=1)

    def ln(x, g, b):
        mu = jnp.mean(x, axis=-1, keepdims=True)
        v = jnp.mean((x - mu) ** 2, axis=-1, keepdims=True)
        return (x - mu) / jnp.sqrt(v + LN_EPS) * g + b

    def leaky(x):
        return jnp.maximum(x, LEAK * x)

    def mlp(p, x):
        W1, b1, g1, be1, W2, b2, g2, be2, W3, b3 = p
        h = leaky(ln(x @ W1 + b1, g1, be1))
        h = leaky(ln(h @ W2 + b2, g2, be2))
        return h @ W3 + b3

    out_lin = mlp(lin, c_in)
    adj, x_mem = out_lin[:, :n_o], out_lin[:, n_o:]
    out_sig = jax.nn.sigmoid(mlp(sig, c_in))
    filt, mem_clear = out_sig[:, :n_o], out_sig[:, n_o:]
    memory_new = mem_clear * memory + x_mem
    x = filt * st + adj

    def tend(y):
        return ((jnp.roll(y, -1, -1) - jnp.roll(y, 2, -1)) * jnp.roll(y, 1, -1)
                - y + F_L96)

    y = x
    for _ in range(N_STEPS):
        k1 = tend(y)
        k2 = tend(y + DT * k1 / 3.0)
        k3 = tend(y + DT * (k2 - k1 / 3.0))
        k4 = tend(y + DT * (k1 - k2 + k3))
        y = y + DT * 0.125 * (k1 + 3.0 * (k2 + k3) + k4)

    ens = x.reshape(B, m, n_o)
    return jnp.mean(ens, axis=1), y.reshape(B, m, n_o), ens, memory_new


# ----------------------------------------------------------------------------
# MultiObs container
# ----------------------------------------------------------------------------
class MultiObsEnAFPallas:
    """Pallas counterpart of MultiObs_EnAF: one EnAF param-set per obs_type."""

    def __init__(self, state_size, hidden_size, input_types, m, key):
        self.m = m
        self.raw_params = {}
        self.params = {}
        for i, (name, obs_size) in enumerate(sorted(input_types.items())):
            raw = init_enaf_params(jax.random.fold_in(key, i),
                                   obs_size, state_size, hidden_size)
            self.raw_params[name] = raw
            self.params[name] = fuse_enaf_params(raw, obs_size, state_size, hidden_size)
        # TODO(synk): the 'default' ID_Network branch in the PyTorch code is called with
        # an incompatible signature (5 args into forward(x, state)) and cannot execute;
        # only the typed EnAF subnets are implemented here.
        # TODO(synk): when several obs types / timesteps are assimilated per step, stack
        # their params on a leading axis and run one gridded pallas_call to amortize the
        # per-call launch/DMA overhead (the dominant cost at these tiny shapes).

    def __call__(self, observation, state, memory, obs_type):
        return enaf_forward(self.params[obs_type], observation, state, memory)


if __name__ == "__main__":
    key = jax.random.PRNGKey(0)
    B, m = 2, 8                   # batch, ensemble size
    n_o, n_h, n_i = 40, 32, 20    # state, hidden/memory, observation sizes

    model = MultiObsEnAFPallas(n_o, n_h, {"obs_a": n_i}, m, jax.random.fold_in(key, 100))

    k1, k2, k3 = jax.random.split(key, 3)
    observation = jax.random.normal(k1, (B, m, n_i), jnp.float32)
    state = jax.random.normal(k2, (B, m, n_o), jnp.float32)
    memory = 0.1 * jax.random.normal(k3, (B * m, n_h), jnp.float32)

    outs = model(observation, state, memory, "obs_a")
    jax.block_until_ready(outs)
    analysis, state_next, ens, memory_new = outs

    assert analysis.shape == (B, n_o)
    assert state_next.shape == (B, m, n_o)
    assert ens.shape == (B, m, n_o)
    assert memory_new.shape == (B * m, n_h)

    # Validate against the f32 pure-JAX reference (loose tolerance absorbs the
    # intentional bf16 MXU operands; a structural/stencil bug would be O(1) off).
    ref = enaf_reference(model.raw_params["obs_a"], observation, state, memory)
    tols = (0.1, 0.3, 0.15, 0.1)   # analysis, state_next, ens, memory
    for got, want, tol in zip(outs, ref, tols):
        err = float(jnp.max(jnp.abs(got - want)))
        assert err < tol, f"kernel/reference mismatch: max abs err {err} > {tol}"

    print("KERNEL_OK")
</pallas_src>

<mosaic_0001>
module attributes {stable_mosaic.version = 11 : i64} {
  func.func @_enaf_fused_kernel(%arg0: i32, %arg1: memref<1x8x60xbf16, #tpu.memory_space<vmem>>, %arg2: memref<1x8x40xf32, #tpu.memory_space<vmem>>, %arg3: memref<1x8x32xf32, #tpu.memory_space<vmem>>, %arg4: memref<60x64xbf16, #tpu.memory_space<vmem>>, %arg5: memref<40x64xbf16, #tpu.memory_space<vmem>>, %arg6: memref<32x64xbf16, #tpu.memory_space<vmem>>, %arg7: memref<1x64xf32, #tpu.memory_space<vmem>>, %arg8: memref<1x64xf32, #tpu.memory_space<vmem>>, %arg9: memref<1x64xf32, #tpu.memory_space<vmem>>, %arg10: memref<64x64xbf16, #tpu.memory_space<vmem>>, %arg11: memref<1x64xf32, #tpu.memory_space<vmem>>, %arg12: memref<1x64xf32, #tpu.memory_space<vmem>>, %arg13: memref<1x64xf32, #tpu.memory_space<vmem>>, %arg14: memref<64x40xbf16, #tpu.memory_space<vmem>>, %arg15: memref<1x40xf32, #tpu.memory_space<vmem>>, %arg16: memref<64x32xbf16, #tpu.memory_space<vmem>>, %arg17: memref<1x32xf32, #tpu.memory_space<vmem>>, %arg18: memref<64x40xbf16, #tpu.memory_space<vmem>>, %arg19: memref<1x40xf32, #tpu.memory_space<vmem>>, %arg20: memref<64x32xbf16, #tpu.memory_space<vmem>>, %arg21: memref<1x32xf32, #tpu.memory_space<vmem>>, %arg22: memref<40x40xf32, #tpu.memory_space<vmem>>, %arg23: memref<40x40xf32, #tpu.memory_space<vmem>>, %arg24: memref<1x8x40xf32, #tpu.memory_space<vmem>>, %arg25: memref<1x8x40xf32, #tpu.memory_space<vmem>>, %arg26: memref<1x8x32xf32, #tpu.memory_space<vmem>>) attributes {dimension_semantics = [#tpu.dimension_semantics<parallel>], iteration_bounds = array<i64: 2>, scalar_prefetch = 0 : i64, scratch_operands = 0 : i64, tpu.core_type = #tpu.core_type<tc>, window_params = [{transform_indices = @transform_0, window_bounds = array<i64: 1, 8, 60>}, {transform_indices = @transform_1, window_bounds = array<i64: 1, 8, 40>}, {transform_indices = @transform_2, window_bounds = array<i64: 1, 8, 32>}, {pipeline_mode = #tpu.pipeline_mode<synchronous>, transform_indices = @transform_3, window_bounds = array<i64: 60, 64>}, {pipeline_mode = #tpu.pipeline_mode<synchronous>, transform_indices = @transform_4, window_bounds = array<i64: 40, 64>}, {pipeline_mode = #tpu.pipeline_mode<synchronous>, transform_indices = @transform_5, window_bounds = array<i64: 32, 64>}, {pipeline_mode = #tpu.pipeline_mode<synchronous>, transform_indices = @transform_6, window_bounds = array<i64: 1, 64>}, {pipeline_mode = #tpu.pipeline_mode<synchronous>, transform_indices = @transform_7, window_bounds = array<i64: 1, 64>}, {pipeline_mode = #tpu.pipeline_mode<synchronous>, transform_indices = @transform_8, window_bounds = array<i64: 1, 64>}, {pipeline_mode = #tpu.pipeline_mode<synchronous>, transform_indices = @transform_9, window_bounds = array<i64: 64, 64>}, {pipeline_mode = #tpu.pipeline_mode<synchronous>, transform_indices = @transform_10, window_bounds = array<i64: 1, 64>}, {pipeline_mode = #tpu.pipeline_mode<synchronous>, transform_indices = @transform_11, window_bounds = array<i64: 1, 64>}, {pipeline_mode = #tpu.pipeline_mode<synchronous>, transform_indices = @transform_12, window_bounds = array<i64: 1, 64>}, {pipeline_mode = #tpu.pipeline_mode<synchronous>, transform_indices = @transform_13, window_bounds = array<i64: 64, 40>}, {pipeline_mode = #tpu.pipeline_mode<synchronous>, transform_indices = @transform_14, window_bounds = array<i64: 1, 40>}, {pipeline_mode = #tpu.pipeline_mode<synchronous>, transform_indices = @transform_15, window_bounds = array<i64: 64, 32>}, {pipeline_mode = #tpu.pipeline_mode<synchronous>, transform_indices = @transform_16, window_bounds = array<i64: 1, 32>}, {pipeline_mode = #tpu.pipeline_mode<synchronous>, transform_indices = @transform_17, window_bounds = array<i64: 64, 40>}, {pipeline_mode = #tpu.pipeline_mode<synchronous>, transform_indices = @transform_18, window_bounds = array<i64: 1, 40>}, {pipeline_mode = #tpu.pipeline_mode<synchronous>, transform_indices = @transform_19, window_bounds = array<i64: 64, 32>}, {pipeline_mode = #tpu.pipeline_mode<synchronous>, transform_indices = @transform_20, window_bounds = array<i64: 1, 32>}, {pipeline_mode = #tpu.pipeline_mode<synchronous>, transform_indices = @transform_21, window_bounds = array<i64: 40, 40>}, {pipeline_mode = #tpu.pipeline_mode<synchronous>, transform_indices = @transform_22, window_bounds = array<i64: 40, 40>}, {transform_indices = @transform_23, window_bounds = array<i64: 1, 8, 40>}, {transform_indices = @transform_24, window_bounds = array<i64: 1, 8, 40>}, {transform_indices = @transform_25, window_bounds = array<i64: 1, 8, 32>}]} {
    %c0 = arith.constant 0 : index
    %c0_0 = arith.constant 0 : index
    %c0_1 = arith.constant 0 : index
    %0 = vector.load %arg2[%c0, %c0_0, %c0_1] : memref<1x8x40xf32, #tpu.memory_space<vmem>>, vector<1x8x40xf32>
    %cst = arith.constant dense<0.000000e+00> : vector<1x40xf32>
    %1 = vector.multi_reduction <add>, %0, %cst [1] : vector<1x8x40xf32> to vector<1x40xf32>
    %2 = vector.shape_cast %1 : vector<1x40xf32> to vector<1x1x40xf32>
    %cst_2 = arith.constant 8.000000e+00 : f32
    %3 = vector.broadcast %cst_2 : f32 to vector<1x1x40xf32>
    %4 = arith.divf %2, %3 : vector<1x1x40xf32>
    %5 = vector.broadcast %4 : vector<1x1x40xf32> to vector<1x8x40xf32>
    %6 = arith.subf %0, %5 : vector<1x8x40xf32>
    %7 = arith.mulf %6, %6 : vector<1x8x40xf32>
    %cst_3 = arith.constant dense<0.000000e+00> : vector<1x40xf32>
    %8 = vector.multi_reduction <add>, %7, %cst_3 [1] : vector<1x8x40xf32> to vector<1x40xf32>
    %9 = vector.shape_cast %8 : vector<1x40xf32> to vector<1x1x40xf32>
    %cst_4 = arith.constant 0.142857149 : f32
    %10 = vector.broadcast %cst_4 : f32 to vector<1x1x40xf32>
    %11 = arith.mulf %9, %10 : vector<1x1x40xf32>
    %12 = vector.shape_cast %0 : vector<1x8x40xf32> to vector<8x40xf32>
    %c0_5 = arith.constant 0 : index
    %c0_6 = arith.constant 0 : index
    %c0_7 = arith.constant 0 : index
    %13 = vector.load %arg1[%c0_5, %c0_6, %c0_7] : memref<1x8x60xbf16, #tpu.memory_space<vmem>>, vector<1x8x60xbf16>
    %14 = vector.shape_cast %13 : vector<1x8x60xbf16> to vector<8x60xbf16>
    %c0_8 = arith.constant 0 : index
    %c0_9 = arith.constant 0 : index
    %c0_10 = arith.constant 0 : index
    %15 = vector.load %arg3[%c0_8, %c0_9, %c0_10] : memref<1x8x32xf32, #tpu.memory_space<vmem>>, vector<1x8x32xf32>
    %16 = vector.shape_cast %15 : vector<1x8x32xf32> to vector<8x32xf32>
    %c0_11 = arith.constant 0 : index
    %c0_12 = arith.constant 0 : index
    %17 = vector.load %arg4[%c0_11, %c0_12] : memref<60x64xbf16, #tpu.memory_space<vmem>>, vector<60x64xbf16>
    %cst_13 = arith.constant dense<0.000000e+00> : vector<8x64xf32>
    %18 = tpu.matmul %14, %17, %cst_13 {dimension_numbers = #tpu.dot_dimension_numbers<[1], [0], [0], [1], [0, 0, 1, 1], [], []>} : vector<8x60xbf16>, vector<60x64xbf16>, vector<8x64xf32> -> vector<8x64xf32>
    %19 = arith.truncf %16 : vector<8x32xf32> to vector<8x32xbf16>
    %c0_14 = arith.constant 0 : index
    %c0_15 = arith.constant 0 : index
    %20 = vector.load %arg6[%c0_14, %c0_15] : memref<32x64xbf16, #tpu.memory_space<vmem>>, vector<32x64xbf16>
    %cst_16 = arith.constant dense<0.000000e+00> : vector<8x64xf32>
    %21 = tpu.matmul %19, %20, %cst_16 {dimension_numbers = #tpu.dot_dimension_numbers<[1], [0], [0], [1], [0, 0, 1, 1], [], []>} : vector<8x32xbf16>, vector<32x64xbf16>, vector<8x64xf32> -> vector<8x64xf32>
    %22 = arith.addf %18, %21 : vector<8x64xf32>
    %23 = vector.shape_cast %11 : vector<1x1x40xf32> to vector<1x1x40xf32>
    %24 = vector.broadcast %23 : vector<1x1x40xf32> to vector<1x8x40xf32>
    %25 = vector.shape_cast %24 : vector<1x8x40xf32> to vector<8x40xf32>
    %26 = arith.truncf %25 : vector<8x40xf32> to vector<8x40xbf16>
    %c0_17 = arith.constant 0 : index
    %c0_18 = arith.constant 0 : index
    %27 = vector.load %arg5[%c0_17, %c0_18] : memref<40x64xbf16, #tpu.memory_space<vmem>>, vector<40x64xbf16>
    %cst_19 = arith.constant dense<0.000000e+00> : vector<8x64xf32>
    %28 = tpu.matmul %26, %27, %cst_19 {dimension_numbers = #tpu.dot_dimension_numbers<[1], [0], [0], [1], [0, 0, 1, 1], [], []>} : vector<8x40xbf16>, vector<40x64xbf16>, vector<8x64xf32> -> vector<8x64xf32>
    %29 = arith.addf %22, %28 : vector<8x64xf32>
    %c0_20 = arith.constant 0 : index
    %c0_21 = arith.constant 0 : index
    %30 = vector.load %arg7[%c0_20, %c0_21] : memref<1x64xf32, #tpu.memory_space<vmem>>, vector<1x64xf32>
    %31 = vector.broadcast %30 : vector<1x64xf32> to vector<8x64xf32>
    %32 = arith.addf %29, %31 : vector<8x64xf32>
    %33 = tpu.iota {dimensions = array<i32: 1>} : vector<8x64xi32>
    %c32_i32 = arith.constant 32 : i32
    %34 = vector.broadcast %c32_i32 : i32 to vector<8x64xi32>
    %35 = arith.cmpi sge, %33, %34 : vector<8x64xi32>
    %c0_22 = arith.constant 0 : index
    %c0_23 = arith.constant 0 : index
    %36 = vector.load %arg8[%c0_22, %c0_23] : memref<1x64xf32, #tpu.memory_space<vmem>>, vector<1x64xf32>
    %c0_24 = arith.constant 0 : index
    %c0_25 = arith.constant 0 : index
    %37 = vector.load %arg9[%c0_24, %c0_25] : memref<1x64xf32, #tpu.memory_space<vmem>>, vector<1x64xf32>
    %cst_26 = arith.constant 0.000000e+00 : f32
    %38 = vector.broadcast %cst_26 : f32 to vector<8x64xf32>
    %39 = arith.select %35, %38, %32 : vector<8x64xi1>, vector<8x64xf32>
    %cst_27 = arith.constant 0.000000e+00 : f32
    %40 = vector.broadcast %cst_27 : f32 to vector<8x64xf32>
    %41 = arith.select %35, %32, %40 : vector<8x64xi1>, vector<8x64xf32>
    %cst_28 = arith.constant dense<0.000000e+00> : vector<8xf32>
    %42 = vector.multi_reduction <add>, %41, %cst_28 [1] : vector<8x64xf32> to vector<8xf32>
    %43 = vector.shape_cast %42 : vector<8xf32> to vector<8x1xf32>
    %cst_29 = arith.constant dense<0.000000e+00> : vector<8xf32>
    %44 = vector.multi_reduction <add>, %39, %cst_29 [1] : vector<8x64xf32> to vector<8xf32>
    %45 = vector.shape_cast %44 : vector<8xf32> to vector<8x1xf32>
    %46 = vector.shape_cast %43 : vector<8x1xf32> to vector<8x1xf32>
    %47 = vector.broadcast %46 : vector<8x1xf32> to vector<8x64xf32>
    %48 = vector.shape_cast %45 : vector<8x1xf32> to vector<8x1xf32>
    %49 = vector.broadcast %48 : vector<8x1xf32> to vector<8x64xf32>
    %50 = arith.select %35, %47, %49 : vector<8x64xi1>, vector<8x64xf32>
    %cst_30 = arith.constant 3.125000e-02 : f32
    %51 = vector.broadcast %cst_30 : f32 to vector<8x64xf32>
    %52 = arith.mulf %50, %51 : vector<8x64xf32>
    %53 = arith.subf %32, %52 : vector<8x64xf32>
    %cst_31 = arith.constant 0.000000e+00 : f32
    %54 = vector.broadcast %cst_31 : f32 to vector<8x64xf32>
    %55 = arith.select %35, %54, %53 : vector<8x64xi1>, vector<8x64xf32>
    %cst_32 = arith.constant 0.000000e+00 : f32
    %56 = vector.broadcast %cst_32 : f32 to vector<8x64xf32>
    %57 = arith.select %35, %53, %56 : vector<8x64xi1>, vector<8x64xf32>
    %58 = arith.mulf %57, %57 : vector<8x64xf32>
    %cst_33 = arith.constant dense<0.000000e+00> : vector<8xf32>
    %59 = vector.multi_reduction <add>, %58, %cst_33 [1] : vector<8x64xf32> to vector<8xf32>
    %60 = vector.shape_cast %59 : vector<8xf32> to vector<8x1xf32>
    %61 = arith.mulf %55, %55 : vector<8x64xf32>
    %cst_34 = arith.constant dense<0.000000e+00> : vector<8xf32>
    %62 = vector.multi_reduction <add>, %61, %cst_34 [1] : vector<8x64xf32> to vector<8xf32>
    %63 = vector.shape_cast %62 : vector<8xf32> to vector<8x1xf32>
    %64 = vector.shape_cast %60 : vector<8x1xf32> to vector<8x1xf32>
    %65 = vector.broadcast %64 : vector<8x1xf32> to vector<8x64xf32>
    %66 = vector.shape_cast %63 : vector<8x1xf32> to vector<8x1xf32>
    %67 = vector.broadcast %66 : vector<8x1xf32> to vector<8x64xf32>
    %68 = arith.select %35, %65, %67 : vector<8x64xi1>, vector<8x64xf32>
    %cst_35 = arith.constant 3.125000e-02 : f32
    %69 = vector.broadcast %cst_35 : f32 to vector<8x64xf32>
    %70 = arith.mulf %68, %69 : vector<8x64xf32>
    %cst_36 = arith.constant 9.99999974E-6 : f32
    %71 = vector.broadcast %cst_36 : f32 to vector<8x64xf32>
    %72 = arith.addf %70, %71 : vector<8x64xf32>
    %73 = math.rsqrt %72 : vector<8x64xf32>
    %74 = arith.mulf %53, %73 : vector<8x64xf32>
    %75 = vector.broadcast %36 : vector<1x64xf32> to vector<8x64xf32>
    %76 = arith.mulf %74, %75 : vector<8x64xf32>
    %77 = vector.broadcast %37 : vector<1x64xf32> to vector<8x64xf32>
    %78 = arith.addf %76, %77 : vector<8x64xf32>
    %cst_37 = arith.constant 0.00999999977 : f32
    %79 = vector.broadcast %cst_37 : f32 to vector<8x64xf32>
    %80 = arith.mulf %79, %78 : vector<8x64xf32>
    %81 = arith.maximumf %78, %80 : vector<8x64xf32>
    %82 = arith.truncf %81 : vector<8x64xf32> to vector<8x64xbf16>
    %c0_38 = arith.constant 0 : index
    %c0_39 = arith.constant 0 : index
    %83 = vector.load %arg10[%c0_38, %c0_39] : memref<64x64xbf16, #tpu.memory_space<vmem>>, vector<64x64xbf16>
    %cst_40 = arith.constant dense<0.000000e+00> : vector<8x64xf32>
    %84 = tpu.matmul %82, %83, %cst_40 {dimension_numbers = #tpu.dot_dimension_numbers<[1], [0], [0], [1], [0, 0, 1, 1], [], []>} : vector<8x64xbf16>, vector<64x64xbf16>, vector<8x64xf32> -> vector<8x64xf32>
    %c0_41 = arith.constant 0 : index
    %c0_42 = arith.constant 0 : index
    %85 = vector.load %arg11[%c0_41, %c0_42] : memref<1x64xf32, #tpu.memory_space<vmem>>, vector<1x64xf32>
    %86 = vector.broadcast %85 : vector<1x64xf32> to vector<8x64xf32>
    %87 = arith.addf %84, %86 : vector<8x64xf32>
    %c0_43 = arith.constant 0 : index
    %c0_44 = arith.constant 0 : index
    %88 = vector.load %arg12[%c0_43, %c0_44] : memref<1x64xf32, #tpu.memory_space<vmem>>, vector<1x64xf32>
    %c0_45 = arith.constant 0 : index
    %c0_46 = arith.constant 0 : index
    %89 = vector.load %arg13[%c0_45, %c0_46] : memref<1x64xf32, #tpu.memory_space<vmem>>, vector<1x64xf32>
    %cst_47 = arith.constant 0.000000e+00 : f32
    %90 = vector.broadcast %cst_47 : f32 to vector<8x64xf32>
    %91 = arith.select %35, %90, %87 : vector<8x64xi1>, vector<8x64xf32>
    %cst_48 = arith.constant 0.000000e+00 : f32
    %92 = vector.broadcast %cst_48 : f32 to vector<8x64xf32>
    %93 = arith.select %35, %87, %92 : vector<8x64xi1>, vector<8x64xf32>
    %cst_49 = arith.constant dense<0.000000e+00> : vector<8xf32>
    %94 = vector.multi_reduction <add>, %93, %cst_49 [1] : vector<8x64xf32> to vector<8xf32>
    %95 = vector.shape_cast %94 : vector<8xf32> to vector<8x1xf32>
    %cst_50 = arith.constant dense<0.000000e+00> : vector<8xf32>
    %96 = vector.multi_reduction <add>, %91, %cst_50 [1] : vector<8x64xf32> to vector<8xf32>
    %97 = vector.shape_cast %96 : vector<8xf32> to vector<8x1xf32>
    %98 = vector.shape_cast %95 : vector<8x1xf32> to vector<8x1xf32>
    %99 = vector.broadcast %98 : vector<8x1xf32> to vector<8x64xf32>
    %100 = vector.shape_cast %97 : vector<8x1xf32> to vector<8x1xf32>
    %101 = vector.broadcast %100 : vector<8x1xf32> to vector<8x64xf32>
    %102 = arith.select %35, %99, %101 : vector<8x64xi1>, vector<8x64xf32>
    %cst_51 = arith.constant 3.125000e-02 : f32
    %103 = vector.broadcast %cst_51 : f32 to vector<8x64xf32>
    %104 = arith.mulf %102, %103 : vector<8x64xf32>
    %105 = arith.subf %87, %104 : vector<8x64xf32>
    %cst_52 = arith.constant 0.000000e+00 : f32
    %106 = vector.broadcast %cst_52 : f32 to vector<8x64xf32>
    %107 = arith.select %35, %106, %105 : vector<8x64xi1>, vector<8x64xf32>
    %cst_53 = arith.constant 0.000000e+00 : f32
    %108 = vector.broadcast %cst_53 : f32 to vector<8x64xf32>
    %109 = arith.select %35, %105, %108 : vector<8x64xi1>, vector<8x64xf32>
    %110 = arith.mulf %109, %109 : vector<8x64xf32>
    %cst_54 = arith.constant dense<0.000000e+00> : vector<8xf32>
    %111 = vector.multi_reduction <add>, %110, %cst_54 [1] : vector<8x64xf32> to vector<8xf32>
    %112 = vector.shape_cast %111 : vector<8xf32> to vector<8x1xf32>
    %113 = arith.mulf %107, %107 : vector<8x64xf32>
    %cst_55 = arith.constant dense<0.000000e+00> : vector<8xf32>
    %114 = vector.multi_reduction <add>, %113, %cst_55 [1] : vector<8x64xf32> to vector<8xf32>
    %115 = vector.shape_cast %114 : vector<8xf32> to vector<8x1xf32>
    %116 = vector.shape_cast %112 : vector<8x1xf32> to vector<8x1xf32>
    %117 = vector.broadcast %116 : vector<8x1xf32> to vector<8x64xf32>
    %118 = vector.shape_cast %115 : vector<8x1xf32> to vector<8x1xf32>
    %119 = vector.broadcast %118 : vector<8x1xf32> to vector<8x64xf32>
    %120 = arith.select %35, %117, %119 : vector<8x64xi1>, vector<8x64xf32>
    %cst_56 = arith.constant 3.125000e-02 : f32
    %121 = vector.broadcast %cst_56 : f32 to vector<8x64xf32>
    %122 = arith.mulf %120, %121 : vector<8x64xf32>
    %cst_57 = arith.constant 9.99999974E-6 : f32
    %123 = vector.broadcast %cst_57 : f32 to vector<8x64xf32>
    %124 = arith.addf %122, %123 : vector<8x64xf32>
    %125 = math.rsqrt %124 : vector<8x64xf32>
    %126 = arith.mulf %105, %125 : vector<8x64xf32>
    %127 = vector.broadcast %88 : vector<1x64xf32> to vector<8x64xf32>
    %128 = arith.mulf %126, %127 : vector<8x64xf32>
    %129 = vector.broadcast %89 : vector<1x64xf32> to vector<8x64xf32>
    %130 = arith.addf %128, %129 : vector<8x64xf32>
    %cst_58 = arith.constant 0.00999999977 : f32
    %131 = vector.broadcast %cst_58 : f32 to vector<8x64xf32>
    %132 = arith.mulf %131, %130 : vector<8x64xf32>
    %133 = arith.maximumf %130, %132 : vector<8x64xf32>
    %134 = arith.truncf %133 : vector<8x64xf32> to vector<8x64xbf16>
    %c0_59 = arith.constant 0 : index
    %c0_60 = arith.constant 0 : index
    %135 = vector.load %arg14[%c0_59, %c0_60] : memref<64x40xbf16, #tpu.memory_space<vmem>>, vector<64x40xbf16>
    %cst_61 = arith.constant dense<0.000000e+00> : vector<8x40xf32>
    %136 = tpu.matmul %134, %135, %cst_61 {dimension_numbers = #tpu.dot_dimension_numbers<[1], [0], [0], [1], [0, 0, 1, 1], [], []>} : vector<8x64xbf16>, vector<64x40xbf16>, vector<8x40xf32> -> vector<8x40xf32>
    %c0_62 = arith.constant 0 : index
    %c0_63 = arith.constant 0 : index
    %137 = vector.load %arg15[%c0_62, %c0_63] : memref<1x40xf32, #tpu.memory_space<vmem>>, vector<1x40xf32>
    %138 = vector.broadcast %137 : vector<1x40xf32> to vector<8x40xf32>
    %139 = arith.addf %136, %138 : vector<8x40xf32>
    %c0_64 = arith.constant 0 : index
    %c0_65 = arith.constant 0 : index
    %140 = vector.load %arg16[%c0_64, %c0_65] : memref<64x32xbf16, #tpu.memory_space<vmem>>, vector<64x32xbf16>
    %cst_66 = arith.constant dense<0.000000e+00> : vector<8x32xf32>
    %141 = tpu.matmul %134, %140, %cst_66 {dimension_numbers = #tpu.dot_dimension_numbers<[1], [0], [0], [1], [0, 0, 1, 1], [], []>} : vector<8x64xbf16>, vector<64x32xbf16>, vector<8x32xf32> -> vector<8x32xf32>
    %c0_67 = arith.constant 0 : index
    %c0_68 = arith.constant 0 : index
    %142 = vector.load %arg17[%c0_67, %c0_68] : memref<1x32xf32, #tpu.memory_space<vmem>>, vector<1x32xf32>
    %143 = vector.broadcast %142 : vector<1x32xf32> to vector<8x32xf32>
    %144 = arith.addf %141, %143 : vector<8x32xf32>
    %c0_69 = arith.constant 0 : index
    %c0_70 = arith.constant 0 : index
    %145 = vector.load %arg18[%c0_69, %c0_70] : memref<64x40xbf16, #tpu.memory_space<vmem>>, vector<64x40xbf16>
    %cst_71 = arith.constant dense<0.000000e+00> : vector<8x40xf32>
    %146 = tpu.matmul %134, %145, %cst_71 {dimension_numbers = #tpu.dot_dimension_numbers<[1], [0], [0], [1], [0, 0, 1, 1], [], []>} : vector<8x64xbf16>, vector<64x40xbf16>, vector<8x40xf32> -> vector<8x40xf32>
    %c0_72 = arith.constant 0 : index
    %c0_73 = arith.constant 0 : index
    %147 = vector.load %arg19[%c0_72, %c0_73] : memref<1x40xf32, #tpu.memory_space<vmem>>, vector<1x40xf32>
    %148 = vector.broadcast %147 : vector<1x40xf32> to vector<8x40xf32>
    %149 = arith.addf %146, %148 : vector<8x40xf32>
    %150 = arith.negf %149 : vector<8x40xf32>
    %151 = math.exp %150 : vector<8x40xf32>
    %cst_74 = arith.constant 1.000000e+00 : f32
    %152 = vector.broadcast %cst_74 : f32 to vector<8x40xf32>
    %153 = arith.addf %152, %151 : vector<8x40xf32>
    %154 = arith.divf %152, %153 : vector<8x40xf32>
    %c0_75 = arith.constant 0 : index
    %c0_76 = arith.constant 0 : index
    %155 = vector.load %arg20[%c0_75, %c0_76] : memref<64x32xbf16, #tpu.memory_space<vmem>>, vector<64x32xbf16>
    %cst_77 = arith.constant dense<0.000000e+00> : vector<8x32xf32>
    %156 = tpu.matmul %134, %155, %cst_77 {dimension_numbers = #tpu.dot_dimension_numbers<[1], [0], [0], [1], [0, 0, 1, 1], [], []>} : vector<8x64xbf16>, vector<64x32xbf16>, vector<8x32xf32> -> vector<8x32xf32>
    %c0_78 = arith.constant 0 : index
    %c0_79 = arith.constant 0 : index
    %157 = vector.load %arg21[%c0_78, %c0_79] : memref<1x32xf32, #tpu.memory_space<vmem>>, vector<1x32xf32>
    %158 = vector.broadcast %157 : vector<1x32xf32> to vector<8x32xf32>
    %159 = arith.addf %156, %158 : vector<8x32xf32>
    %160 = arith.negf %159 : vector<8x32xf32>
    %161 = math.exp %160 : vector<8x32xf32>
    %cst_80 = arith.constant 1.000000e+00 : f32
    %162 = vector.broadcast %cst_80 : f32 to vector<8x32xf32>
    %163 = arith.addf %162, %161 : vector<8x32xf32>
    %164 = arith.divf %162, %163 : vector<8x32xf32>
    %165 = arith.mulf %164, %16 : vector<8x32xf32>
    %166 = arith.addf %165, %144 : vector<8x32xf32>
    %167 = vector.shape_cast %166 : vector<8x32xf32> to vector<1x8x32xf32>
    %c0_81 = arith.constant 0 : index
    %c0_82 = arith.constant 0 : index
    %c0_83 = arith.constant 0 : index
    %168 = vector.load %arg26[%c0_81, %c0_82, %c0_83] : memref<1x8x32xf32, #tpu.memory_space<vmem>>, vector<1x8x32xf32>
    tpu.vector_store %arg26[%c0_81, %c0_82, %c0_83], %167 {strides = array<i32>} : memref<1x8x32xf32, #tpu.memory_space<vmem>>, vector<1x8x32xf32>,
    %169 = arith.mulf %154, %12 : vector<8x40xf32>
    %170 = arith.addf %169, %139 : vector<8x40xf32>
    %c0_84 = arith.constant 0 : index
    %c0_85 = arith.constant 0 : index
    %171 = vector.load %arg22[%c0_84, %c0_85] : memref<40x40xf32, #tpu.memory_space<vmem>>, vector<40x40xf32>
    %c0_86 = arith.constant 0 : index
    %c0_87 = arith.constant 0 : index
    %172 = vector.load %arg23[%c0_86, %c0_87] : memref<40x40xf32, #tpu.memory_space<vmem>>, vector<40x40xf32>
    %cst_88 = arith.constant dense<0.000000e+00> : vector<8x40xf32>
    %173 = tpu.matmul %170, %171, %cst_88 {dimension_numbers = #tpu.dot_dimension_numbers<[1], [0], [0], [1], [0, 0, 1, 1], [], []>} : vector<8x40xf32>, vector<40x40xf32>, vector<8x40xf32> -> vector<8x40xf32>
    %cst_89 = arith.constant dense<0.000000e+00> : vector<8x40xf32>
    %174 = tpu.matmul %170, %172, %cst_89 {dimension_numbers = #tpu.dot_dimension_numbers<[1], [0], [0], [1], [0, 0, 1, 1], [], []>} : vector<8x40xf32>, vector<40x40xf32>, vector<8x40xf32> -> vector<8x40xf32>
    %175 = arith.mulf %173, %174 : vector<8x40xf32>
    %176 = arith.subf %175, %170 : vector<8x40xf32>
    %cst_90 = arith.constant 8.000000e+00 : f32
    %177 = vector.broadcast %cst_90 : f32 to vector<8x40xf32>
    %178 = arith.addf %176, %177 : vector<8x40xf32>
    %cst_91 = arith.constant 5.000000e-02 : f32
    %179 = vector.broadcast %cst_91 : f32 to vector<8x40xf32>
    %180 = arith.mulf %179, %178 : vector<8x40xf32>
    %cst_92 = arith.constant 0.333333343 : f32
    %181 = vector.broadcast %cst_92 : f32 to vector<8x40xf32>
    %182 = arith.mulf %180, %181 : vector<8x40xf32>
    %183 = arith.addf %170, %182 : vector<8x40xf32>
    %cst_93 = arith.constant dense<0.000000e+00> : vector<8x40xf32>
    %184 = tpu.matmul %183, %171, %cst_93 {dimension_numbers = #tpu.dot_dimension_numbers<[1], [0], [0], [1], [0, 0, 1, 1], [], []>} : vector<8x40xf32>, vector<40x40xf32>, vector<8x40xf32> -> vector<8x40xf32>
    %cst_94 = arith.constant dense<0.000000e+00> : vector<8x40xf32>
    %185 = tpu.matmul %183, %172, %cst_94 {dimension_numbers = #tpu.dot_dimension_numbers<[1], [0], [0], [1], [0, 0, 1, 1], [], []>} : vector<8x40xf32>, vector<40x40xf32>, vector<8x40xf32> -> vector<8x40xf32>
    %186 = arith.mulf %184, %185 : vector<8x40xf32>
    %187 = arith.subf %186, %183 : vector<8x40xf32>
    %cst_95 = arith.constant 8.000000e+00 : f32
    %188 = vector.broadcast %cst_95 : f32 to vector<8x40xf32>
    %189 = arith.addf %187, %188 : vector<8x40xf32>
    %cst_96 = arith.constant 0.333333343 : f32
    %190 = vector.broadcast %cst_96 : f32 to vector<8x40xf32>
    %191 = arith.mulf %178, %190 : vector<8x40xf32>
    %192 = arith.subf %189, %191 : vector<8x40xf32>
    %cst_97 = arith.constant 5.000000e-02 : f32
    %193 = vector.broadcast %cst_97 : f32 to vector<8x40xf32>
    %194 = arith.mulf %193, %192 : vector<8x40xf32>
    %195 = arith.addf %170, %194 : vector<8x40xf32>
    %cst_98 = arith.constant dense<0.000000e+00> : vector<8x40xf32>
    %196 = tpu.matmul %195, %171, %cst_98 {dimension_numbers = #tpu.dot_dimension_numbers<[1], [0], [0], [1], [0, 0, 1, 1], [], []>} : vector<8x40xf32>, vector<40x40xf32>, vector<8x40xf32> -> vector<8x40xf32>
    %cst_99 = arith.constant dense<0.000000e+00> : vector<8x40xf32>
    %197 = tpu.matmul %195, %172, %cst_99 {dimension_numbers = #tpu.dot_dimension_numbers<[1], [0], [0], [1], [0, 0, 1, 1], [], []>} : vector<8x40xf32>, vector<40x40xf32>, vector<8x40xf32> -> vector<8x40xf32>
    %198 = arith.mulf %196, %197 : vector<8x40xf32>
    %199 = arith.subf %198, %195 : vector<8x40xf32>
    %cst_100 = arith.constant 8.000000e+00 : f32
    %200 = vector.broadcast %cst_100 : f32 to vector<8x40xf32>
    %201 = arith.addf %199, %200 : vector<8x40xf32>
    %202 = arith.subf %178, %189 : vector<8x40xf32>
    %203 = arith.addf %202, %201 : vector<8x40xf32>
    %cst_101 = arith.constant 5.000000e-02 : f32
    %204 = vector.broadcast %cst_101 : f32 to vector<8x40xf32>
    %205 = arith.mulf %204, %203 : vector<8x40xf32>
    %206 = arith.addf %170, %205 : vector<8x40xf32>
    %cst_102 = arith.constant dense<0.000000e+00> : vector<8x40xf32>
    %207 = tpu.matmul %206, %171, %cst_102 {dimension_numbers = #tpu.dot_dimension_numbers<[1], [0], [0], [1], [0, 0, 1, 1], [], []>} : vector<8x40xf32>, vector<40x40xf32>, vector<8x40xf32> -> vector<8x40xf32>
    %cst_103 = arith.constant dense<0.000000e+00> : vector<8x40xf32>
    %208 = tpu.matmul %206, %172, %cst_103 {dimension_numbers = #tpu.dot_dimension_numbers<[1], [0], [0], [1], [0, 0, 1, 1], [], []>} : vector<8x40xf32>, vector<40x40xf32>, vector<8x40xf32> -> vector<8x40xf32>
    %209 = arith.mulf %207, %208 : vector<8x40xf32>
    %210 = arith.subf %209, %206 : vector<8x40xf32>
    %cst_104 = arith.constant 8.000000e+00 : f32
    %211 = vector.broadcast %cst_104 : f32 to vector<8x40xf32>
    %212 = arith.addf %210, %211 : vector<8x40xf32>
    %213 = arith.addf %189, %201 : vector<8x40xf32>
    %cst_105 = arith.constant 3.000000e+00 : f32
    %214 = vector.broadcast %cst_105 : f32 to vector<8x40xf32>
    %215 = arith.mulf %214, %213 : vector<8x40xf32>
    %216 = arith.addf %178, %215 : vector<8x40xf32>
    %217 = arith.addf %216, %212 : vector<8x40xf32>
    %cst_106 = arith.constant 6.250000e-03 : f32
    %218 = vector.broadcast %cst_106 : f32 to vector<8x40xf32>
    %219 = arith.mulf %218, %217 : vector<8x40xf32>
    %220 = arith.addf %170, %219 : vector<8x40xf32>
    %cst_107 = arith.constant dense<0.000000e+00> : vector<8x40xf32>
    %221 = tpu.matmul %220, %171, %cst_107 {dimension_numbers = #tpu.dot_dimension_numbers<[1], [0], [0], [1], [0, 0, 1, 1], [], []>} : vector<8x40xf32>, vector<40x40xf32>, vector<8x40xf32> -> vector<8x40xf32>
    %cst_108 = arith.constant dense<0.000000e+00> : vector<8x40xf32>
    %222 = tpu.matmul %220, %172, %cst_108 {dimension_numbers = #tpu.dot_dimension_numbers<[1], [0], [0], [1], [0, 0, 1, 1], [], []>} : vector<8x40xf32>, vector<40x40xf32>, vector<8x40xf32> -> vector<8x40xf32>
    %223 = arith.mulf %221, %222 : vector<8x40xf32>
    %224 = arith.subf %223, %220 : vector<8x40xf32>
    %cst_109 = arith.constant 8.000000e+00 : f32
    %225 = vector.broadcast %cst_109 : f32 to vector<8x40xf32>
    %226 = arith.addf %224, %225 : vector<8x40xf32>
    %cst_110 = arith.constant 5.000000e-02 : f32
    %227 = vector.broadcast %cst_110 : f32 to vector<8x40xf32>
    %228 = arith.mulf %227, %226 : vector<8x40xf32>
    %cst_111 = arith.constant 0.333333343 : f32
    %229 = vector.broadcast %cst_111 : f32 to vector<8x40xf32>
    %230 = arith.mulf %228, %229 : vector<8x40xf32>
    %231 = arith.addf %220, %230 : vector<8x40xf32>
    %cst_112 = arith.constant dense<0.000000e+00> : vector<8x40xf32>
    %232 = tpu.matmul %231, %171, %cst_112 {dimension_numbers = #tpu.dot_dimension_numbers<[1], [0], [0], [1], [0, 0, 1, 1], [], []>} : vector<8x40xf32>, vector<40x40xf32>, vector<8x40xf32> -> vector<8x40xf32>
    %cst_113 = arith.constant dense<0.000000e+00> : vector<8x40xf32>
    %233 = tpu.matmul %231, %172, %cst_113 {dimension_numbers = #tpu.dot_dimension_numbers<[1], [0], [0], [1], [0, 0, 1, 1], [], []>} : vector<8x40xf32>, vector<40x40xf32>, vector<8x40xf32> -> vector<8x40xf32>
    %234 = arith.mulf %232, %233 : vector<8x40xf32>
    %235 = arith.subf %234, %231 : vector<8x40xf32>
    %cst_114 = arith.constant 8.000000e+00 : f32
    %236 = vector.broadcast %cst_114 : f32 to vector<8x40xf32>
    %237 = arith.addf %235, %236 : vector<8x40xf32>
    %cst_115 = arith.constant 0.333333343 : f32
    %238 = vector.broadcast %cst_115 : f32 to vector<8x40xf32>
    %239 = arith.mulf %226, %238 : vector<8x40xf32>
    %240 = arith.subf %237, %239 : vector<8x40xf32>
    %cst_116 = arith.constant 5.000000e-02 : f32
    %241 = vector.broadcast %cst_116 : f32 to vector<8x40xf32>
    %242 = arith.mulf %241, %240 : vector<8x40xf32>
    %243 = arith.addf %220, %242 : vector<8x40xf32>
    %cst_117 = arith.constant dense<0.000000e+00> : vector<8x40xf32>
    %244 = tpu.matmul %243, %171, %cst_117 {dimension_numbers = #tpu.dot_dimension_numbers<[1], [0], [0], [1], [0, 0, 1, 1], [], []>} : vector<8x40xf32>, vector<40x40xf32>, vector<8x40xf32> -> vector<8x40xf32>
    %cst_118 = arith.constant dense<0.000000e+00> : vector<8x40xf32>
    %245 = tpu.matmul %243, %172, %cst_118 {dimension_numbers = #tpu.dot_dimension_numbers<[1], [0], [0], [1], [0, 0, 1, 1], [], []>} : vector<8x40xf32>, vector<40x40xf32>, vector<8x40xf32> -> vector<8x40xf32>
    %246 = arith.mulf %244, %245 : vector<8x40xf32>
    %247 = arith.subf %246, %243 : vector<8x40xf32>
    %cst_119 = arith.constant 8.000000e+00 : f32
    %248 = vector.broadcast %cst_119 : f32 to vector<8x40xf32>
    %249 = arith.addf %247, %248 : vector<8x40xf32>
    %250 = arith.subf %226, %237 : vector<8x40xf32>
    %251 = arith.addf %250, %249 : vector<8x40xf32>
    %cst_120 = arith.constant 5.000000e-02 : f32
    %252 = vector.broadcast %cst_120 : f32 to vector<8x40xf32>
    %253 = arith.mulf %252, %251 : vector<8x40xf32>
    %254 = arith.addf %220, %253 : vector<8x40xf32>
    %cst_121 = arith.constant dense<0.000000e+00> : vector<8x40xf32>
    %255 = tpu.matmul %254, %171, %cst_121 {dimension_numbers = #tpu.dot_dimension_numbers<[1], [0], [0], [1], [0, 0, 1, 1], [], []>} : vector<8x40xf32>, vector<40x40xf32>, vector<8x40xf32> -> vector<8x40xf32>
    %cst_122 = arith.constant dense<0.000000e+00> : vector<8x40xf32>
    %256 = tpu.matmul %254, %172, %cst_122 {dimension_numbers = #tpu.dot_dimension_numbers<[1], [0], [0], [1], [0, 0, 1, 1], [], []>} : vector<8x40xf32>, vector<40x40xf32>, vector<8x40xf32> -> vector<8x40xf32>
    %257 = arith.mulf %255, %256 : vector<8x40xf32>
    %258 = arith.subf %257, %254 : vector<8x40xf32>
    %cst_123 = arith.constant 8.000000e+00 : f32
    %259 = vector.broadcast %cst_123 : f32 to vector<8x40xf32>
    %260 = arith.addf %258, %259 : vector<8x40xf32>
    %261 = arith.addf %237, %249 : vector<8x40xf32>
    %cst_124 = arith.constant 3.000000e+00 : f32
    %262 = vector.broadcast %cst_124 : f32 to vector<8x40xf32>
    %263 = arith.mulf %262, %261 : vector<8x40xf32>
    %264 = arith.addf %226, %263 : vector<8x40xf32>
    %265 = arith.addf %264, %260 : vector<8x40xf32>
    %cst_125 = arith.constant 6.250000e-03 : f32
    %266 = vector.broadcast %cst_125 : f32 to vector<8x40xf32>
    %267 = arith.mulf %266, %265 : vector<8x40xf32>
    %268 = arith.addf %220, %267 : vector<8x40xf32>
    %269 = vector.shape_cast %170 : vector<8x40xf32> to vector<1x8x40xf32>
    %c0_126 = arith.constant 0 : index
    %c0_127 = arith.constant 0 : index
    %c0_128 = arith.constant 0 : index
    %270 = vector.load %arg24[%c0_126, %c0_127, %c0_128] : memref<1x8x40xf32, #tpu.memory_space<vmem>>, vector<1x8x40xf32>
    tpu.vector_store %arg24[%c0_126, %c0_127, %c0_128], %269 {strides = array<i32>} : memref<1x8x40xf32, #tpu.memory_space<vmem>>, vector<1x8x40xf32>,
    %271 = vector.shape_cast %268 : vector<8x40xf32> to vector<1x8x40xf32>
    %c0_129 = arith.constant 0 : index
    %c0_130 = arith.constant 0 : index
    %c0_131 = arith.constant 0 : index
    %272 = vector.load %arg25[%c0_129, %c0_130, %c0_131] : memref<1x8x40xf32, #tpu.memory_space<vmem>>, vector<1x8x40xf32>
    tpu.vector_store %arg25[%c0_129, %c0_130, %c0_131], %271 {strides = array<i32>} : memref<1x8x40xf32, #tpu.memory_space<vmem>>, vector<1x8x40xf32>,
    return
  }
  func.func @transform_0(%arg0: i32) -> (i32, i32, i32) {
    %c0_i32 = arith.constant 0 : i32
    %c0_i32_0 = arith.constant 0 : i32
    %c0_i32_1 = arith.constant 0 : i32
    return %arg0, %c0_i32, %c0_i32_0 : i32, i32, i32
  }
  func.func @transform_1(%arg0: i32) -> (i32, i32, i32) {
    %c0_i32 = arith.constant 0 : i32
    %c0_i32_0 = arith.constant 0 : i32
    %c0_i32_1 = arith.constant 0 : i32
    return %arg0, %c0_i32, %c0_i32_0 : i32, i32, i32
  }
  func.func @transform_2(%arg0: i32) -> (i32, i32, i32) {
    %c0_i32 = arith.constant 0 : i32
    %c0_i32_0 = arith.constant 0 : i32
    %c0_i32_1 = arith.constant 0 : i32
    return %arg0, %c0_i32, %c0_i32_0 : i32, i32, i32
  }
  func.func @transform_3(%arg0: i32) -> (i32, i32) {
    %c0_i32 = arith.constant 0 : i32
    %c0_i32_0 = arith.constant 0 : i32
    %c0_i32_1 = arith.constant 0 : i32
    return %c0_i32, %c0_i32_0 : i32, i32
  }
  func.func @transform_4(%arg0: i32) -> (i32, i32) {
    %c0_i32 = arith.constant 0 : i32
    %c0_i32_0 = arith.constant 0 : i32
    %c0_i32_1 = arith.constant 0 : i32
    return %c0_i32, %c0_i32_0 : i32, i32
  }
  func.func @transform_5(%arg0: i32) -> (i32, i32) {
    %c0_i32 = arith.constant 0 : i32
    %c0_i32_0 = arith.constant 0 : i32
    %c0_i32_1 = arith.constant 0 : i32
    return %c0_i32, %c0_i32_0 : i32, i32
  }
  func.func @transform_6(%arg0: i32) -> (i32, i32) {
    %c0_i32 = arith.constant 0 : i32
    %c0_i32_0 = arith.constant 0 : i32
    %c0_i32_1 = arith.constant 0 : i32
    return %c0_i32, %c0_i32_0 : i32, i32
  }
  func.func @transform_7(%arg0: i32) -> (i32, i32) {
    %c0_i32 = arith.constant 0 : i32
    %c0_i32_0 = arith.constant 0 : i32
    %c0_i32_1 = arith.constant 0 : i32
    return %c0_i32, %c0_i32_0 : i32, i32
  }
  func.func @transform_8(%arg0: i32) -> (i32, i32) {
    %c0_i32 = arith.constant 0 : i32
    %c0_i32_0 = arith.constant 0 : i32
    %c0_i32_1 = arith.constant 0 : i32
    return %c0_i32, %c0_i32_0 : i32, i32
  }
  func.func @transform_9(%arg0: i32) -> (i32, i32) {
    %c0_i32 = arith.constant 0 : i32
    %c0_i32_0 = arith.constant 0 : i32
    %c0_i32_1 = arith.constant 0 : i32
    return %c0_i32, %c0_i32_0 : i32, i32
  }
  func.func @transform_10(%arg0: i32) -> (i32, i32) {
    %c0_i32 = arith.constant 0 : i32
    %c0_i32_0 = arith.constant 0 : i32
    %c0_i32_1 = arith.constant 0 : i32
    return %c0_i32, %c0_i32_0 : i32, i32
  }
  func.func @transform_11(%arg0: i32) -> (i32, i32) {
    %c0_i32 = arith.constant 0 : i32
    %c0_i32_0 = arith.constant 0 : i32
    %c0_i32_1 = arith.constant 0 : i32
    return %c0_i32, %c0_i32_0 : i32, i32
  }
  func.func @transform_12(%arg0: i32) -> (i32, i32) {
    %c0_i32 = arith.constant 0 : i32
    %c0_i32_0 = arith.constant 0 : i32
    %c0_i32_1 = arith.constant 0 : i32
    return %c0_i32, %c0_i32_0 : i32, i32
  }
  func.func @transform_13(%arg0: i32) -> (i32, i32) {
    %c0_i32 = arith.constant 0 : i32
    %c0_i32_0 = arith.constant 0 : i32
    %c0_i32_1 = arith.constant 0 : i32
    return %c0_i32, %c0_i32_0 : i32, i32
  }
  func.func @transform_14(%arg0: i32) -> (i32, i32) {
    %c0_i32 = arith.constant 0 : i32
    %c0_i32_0 = arith.constant 0 : i32
    %c0_i32_1 = arith.constant 0 : i32
    return %c0_i32, %c0_i32_0 : i32, i32
  }
  func.func @transform_15(%arg0: i32) -> (i32, i32) {
    %c0_i32 = arith.constant 0 : i32
    %c0_i32_0 = arith.constant 0 : i32
    %c0_i32_1 = arith.constant 0 : i32
    return %c0_i32, %c0_i32_0 : i32, i32
  }
  func.func @transform_16(%arg0: i32) -> (i32, i32) {
    %c0_i32 = arith.constant 0 : i32
    %c0_i32_0 = arith.constant 0 : i32
    %c0_i32_1 = arith.constant 0 : i32
    return %c0_i32, %c0_i32_0 : i32, i32
  }
  func.func @transform_17(%arg0: i32) -> (i32, i32) {
    %c0_i32 = arith.constant 0 : i32
    %c0_i32_0 = arith.constant 0 : i32
    %c0_i32_1 = arith.constant 0 : i32
    return %c0_i32, %c0_i32_0 : i32, i32
  }
  func.func @transform_18(%arg0: i32) -> (i32, i32) {
    %c0_i32 = arith.constant 0 : i32
    %c0_i32_0 = arith.constant 0 : i32
    %c0_i32_1 = arith.constant 0 : i32
    return %c0_i32, %c0_i32_0 : i32, i32
  }
  func.func @transform_19(%arg0: i32) -> (i32, i32) {
    %c0_i32 = arith.constant 0 : i32
    %c0_i32_0 = arith.constant 0 : i32
    %c0_i32_1 = arith.constant 0 : i32
    return %c0_i32, %c0_i32_0 : i32, i32
  }
  func.func @transform_20(%arg0: i32) -> (i32, i32) {
    %c0_i32 = arith.constant 0 : i32
    %c0_i32_0 = arith.constant 0 : i32
    %c0_i32_1 = arith.constant 0 : i32
    return %c0_i32, %c0_i32_0 : i32, i32
  }
  func.func @transform_21(%arg0: i32) -> (i32, i32) {
    %c0_i32 = arith.constant 0 : i32
    %c0_i32_0 = arith.constant 0 : i32
    %c0_i32_1 = arith.constant 0 : i32
    return %c0_i32, %c0_i32_0 : i32, i32
  }
  func.func @transform_22(%arg0: i32) -> (i32, i32) {
    %c0_i32 = arith.constant 0 : i32
    %c0_i32_0 = arith.constant 0 : i32
    %c0_i32_1 = arith.constant 0 : i32
    return %c0_i32, %c0_i32_0 : i32, i32
  }
  func.func @transform_23(%arg0: i32) -> (i32, i32, i32) {
    %c0_i32 = arith.constant 0 : i32
    %c0_i32_0 = arith.constant 0 : i32
    %c0_i32_1 = arith.constant 0 : i32
    return %arg0, %c0_i32, %c0_i32_0 : i32, i32, i32
  }
  func.func @transform_24(%arg0: i32) -> (i32, i32, i32) {
    %c0_i32 = arith.constant 0 : i32
    %c0_i32_0 = arith.constant 0 : i32
    %c0_i32_1 = arith.constant 0 : i32
    return %arg0, %c0_i32, %c0_i32_0 : i32, i32, i32
  }
  func.func @transform_25(%arg0: i32) -> (i32, i32, i32) {
    %c0_i32 = arith.constant 0 : i32
    %c0_i32_0 = arith.constant 0 : i32
    %c0_i32_1 = arith.constant 0 : i32
    return %arg0, %c0_i32, %c0_i32_0 : i32, i32, i32
  }
}

</mosaic_0001>

<bundles_post_ra>
// kernel: tpu_custom_call.1
= control target key start
LH: loop header
LB: loop body
LE: loop exit
PB: predicated region body
PF: predicated region fallthrough
CT: control target
= control target key end

     0   :  { %s5018_s0 = inlined_call_operand.hbm [shape: bf16[2,8,60], index: 0, kind: input, shape index: {}]   ;;  %s5019_s1 = inlined_call_operand.hbm [shape: f32[2,8,40], index: 1, kind: input, shape index: {}]   ;;  %s5020_s2 = inlined_call_operand.hbm [shape: f32[2,8,32], index: 2, kind: input, shape index: {}]   ;;  %s5021_s3 = inlined_call_operand.vmem [shape: bf16[60,64], index: 3, kind: input, shape index: {}]   ;;  %s5022_s4 = inlined_call_operand.vmem [shape: bf16[40,64], index: 4, kind: input, shape index: {}]   ;;  %s5023_s5 = inlined_call_operand.hbm [shape: bf16[32,64], index: 5, kind: input, shape index: {}]   ;;  %s5024_s6 = inlined_call_operand.vmem [shape: f32[1,64], index: 6, kind: input, shape index: {}]   ;;  %s5025_s7 = inlined_call_operand.vmem [shape: f32[1,64], index: 7, kind: input, shape index: {}]   ;;  %s5026_s8 = inlined_call_operand.vmem [shape: f32[1,64], index: 8, kind: input, shape index: {}]   ;;  %s5027_s9 = inlined_call_operand.vmem [shape: bf16[64,64], index: 9, kind: input, shape index: {}]   ;;  %s5028_s10 = inlined_call_operand.vmem [shape: f32[1,64], index: 10, kind: input, shape index: {}]   ;;  %s5029_s11 = inlined_call_operand.vmem [shape: f32[1,64], index: 11, kind: input, shape index: {}]   ;;  %s5030_s12 = inlined_call_operand.vmem [shape: f32[1,64], index: 12, kind: input, shape index: {}]   ;;  %s5031_s13 = inlined_call_operand.vmem [shape: bf16[64,40], index: 13, kind: input, shape index: {}]   ;;  %s5032_s14 = inlined_call_operand.vmem [shape: f32[1,40], index: 14, kind: input, shape index: {}]   ;;  %s5033_s15 = inlined_call_operand.vmem [shape: bf16[64,32], index: 15, kind: input, shape index: {}]   ;;  %s5034_s16 = inlined_call_operand.vmem [shape: f32[1,32], index: 16, kind: input, shape index: {}]   ;;  %s5035_s17 = inlined_call_operand.vmem [shape: bf16[64,40], index: 17, kind: input, shape index: {}]   ;;  %s5036_s18 = inlined_call_operand.vmem [shape: f32[1,40], index: 18, kind: input, shape index: {}]   ;;  %s5037_s19 = inlined_call_operand.vmem [shape: bf16[64,32], index: 19, kind: input, shape index: {}]   ;;  %s5038_s20 = inlined_call_operand.vmem [shape: f32[1,32], index: 20, kind: input, shape index: {}]   ;;  %s5039_s21 = inlined_call_operand.vmem [shape: f32[40,40], index: 21, kind: input, shape index: {}]   ;;  %s5040_s22 = inlined_call_operand.vmem [shape: f32[40,40], index: 22, kind: input, shape index: {}]   ;;  %s5041_s23 = inlined_call_operand.hbm [shape: f32[2,8,40], index: 23, kind: output, shape index: {0}]   ;;  %s5042_s24 = inlined_call_operand.hbm [shape: f32[2,8,40], index: 24, kind: output, shape index: {1}]   ;;  %s5043_s25 = inlined_call_operand.hbm [shape: f32[2,8,32], index: 25, kind: output, shape index: {2}]  }
   0x1   :  { %5083 = sst [smem:[#allocation26_spill]] %s5018_s0 }
   0x2   :  { %5084 = sst [smem:[#allocation27_spill]] %s5019_s1 }
   0x3   :  { %5085 = sst [smem:[#allocation28_spill]] %s5020_s2 }
   0x4   :  { %5086 = sst [smem:[#allocation29_spill]] %s5021_s3 }
   0x5   :  { %5087 = sst [smem:[#allocation30_spill]] %s5022_s4 }
   0x6   :  { %5088 = sst [smem:[#allocation31_spill]] %s5023_s5 }
   0x7   :  { %5089 = sst [smem:[#allocation32_spill]] %s5024_s6 }
   0x8   :  { %5090 = sst [smem:[#allocation33_spill]] %s5025_s7 }
   0x9   :  { %5091 = sst [smem:[#allocation34_spill]] %s5026_s8 }
   0xa   :  { %5092 = sst [smem:[#allocation35_spill]] %s5027_s9 }
   0xb   :  { %5093 = sst [smem:[#allocation36_spill]] %s5030_s12 }
   0xc   :  { %5094 = sst [smem:[#allocation37_spill]] %s5032_s14 }
   0xd   :  { %5095 = sst [smem:[#allocation38_spill]] %s5034_s16 }
   0xe   :  { %5096 = sst [smem:[#allocation39_spill]] %s5035_s17 }
   0xf   :  { %5097 = sst [smem:[#allocation40_spill]] %s5036_s18 }
  0x10   :  { %5098 = sst [smem:[#allocation41_spill]] %s5037_s19 }
  0x11   :  { %5099 = sst [smem:[#allocation42_spill]] %s5038_s20 }
  0x12   :  { %5100 = sst [smem:[#allocation43_spill]] %s5039_s21 }
  0x13   :  { %5101 = sst [smem:[#allocation44_spill]] %s5040_s22 }
  0x14   :  { %5102 = sst [smem:[#allocation45_spill]] %s5041_s23 }
  0x15   :  { %5103 = sst [smem:[#allocation46_spill]] %s5042_s24 }
  0x16   :  { %5104 = sst [smem:[#allocation47_spill]] %s5043_s25 }
  0x17   :  { %31 = vsyncpa [#allocation3], 0 }
  0x18   :  { %33 = vsyncpa [#allocation3 + $0x1], 0 }
  0x19   :  { %34 = vsyncpa [#allocation6], 0 }
  0x1a   :  { %36 = vsyncpa [#allocation6 + $0x1], 0 }
  0x1b   :  { %37 = vsyncpa [#allocation9], 0 }
  0x1c   :  { %38 = vsyncpa [#allocation4], 0 }
  0x1d   :  { %40 = vsyncpa [#allocation4 + $0x1], 0 }
  0x1e   :  { %41 = vsyncpa [#allocation12], 0 }
  0x1f   :  { %43 = vsyncpa [#allocation12 + $0x1], 0  ;;  %s4222_s29 = smov 0   ;;  %s4224_s2 = smov 0  }
  0x20   :  { %s4226_s6 = smov 0   ;;  %s4228_s30 = smov 0  }
  0x21 LB: > { %5105 = sst [smem:[#allocation19_spill]] %s4066_s29  ;;  %s4243_s7 = sadd.s32 1, %s4078_s30   ;;  %s4078_s30 = sphi %s4228_s30, %s5162_s30   ;;  %s4074_s6 = sphi %s4226_s6, %s5164_s6   ;;  %s4070_s2 = sphi %s4224_s2, %s5166_s2   ;;  %s4066_s29 = sphi %s4222_s29, %s5165_s29  }
  0x22   : > { %5106 = sst [smem:[#allocation20_spill]] %s4074_s6  ;;  %s56_s3 = sadd.s32 1, %s4074_s6 }
  0x23   : > { %5107 = sst [smem:[#allocation21_spill]] %s4078_s30  ;;  %s53_s26 = ssub.s32 %s4078_s30, %s4243_s7 }
  0x24   : > { %5108 = sst [smem:[#allocation22_spill]] %s4243_s7  ;;  %p5058_p0 = scmp.ne.s32.totalorder %s4074_s6, %s4070_s2 }
  0x25   : > { %p54_p1 = scmp.eq.s32.totalorder %s53_s26, 0  ;;  %p64_p2 = scmp.eq.s32.totalorder %s4078_s30, 0 }
  0x26   : > { %p3744_p4 = scmp.lt.s32.totalorder %s4078_s30, 2  ;;  %s4260_s8 = sand.u32 1, %s4074_s6  }
  0x27   : > { %s4254_s1 = scalar_select %p54_p1, %s4074_s6, %s56_s3  }
  0x28   : > { %p65_p5 = por %p64_p2, %p5058_p0  ;;  %s731_s27 = sand.u32 1, %s4078_s30  }
  0x29   : > { %5109 = sst [smem:[#allocation23_spill]] %s4254_s1  ;;  %s5057_s4 = sshll.u32 %s4260_s8, 3 }
  0x2a   : > { %p4264_p6 = pnand %p3744_p4, %p65_p5  ;;  %s3092_s9 = sshll.u32 %s4078_s30, 7 }
  0x2b   : > { %s5111_s26 = sld [smem:[#allocation27_spill]]  ;;  %s735_s3 = scalar_lea.vmem [#allocation5], %s5057_s4 }
  0x2c   : > { %s5110_s28 = scalar_select %p4264_p6, 1, 0 }
  0x2d   : > { %s742_s1 = sshll.u32 %s735_s3, 4  ;;  %s5112_s23 = sld [smem:[#allocation28_spill]]  ;;  %s4276_s1 = int_to_ptr.vmem [resolvable:$true] %s742_s1 }
  0x2e   : > { %s4283_s16 = scalar_lea.sflag [#allocation6], %s731_s27  ;;  %p4289_p8 = pneg %p4264_p6 }
  0x30   : > { %s5113_s5 = scalar_select %p4289_p8, 1, 0 }
  0x31   : > { %s4272_s7 = scalar_lea.hbm %s5111_s26, %s3092_s9  ;;  %s3831_s4 = scalar_lea.hbm %s5111_s26, 256 }
  0x32   : > { %s3826_s14 = scalar_lea.hbm %s4272_s7, 128  ;;  %p3832_p11 = scmp.lt.u32.totalorder %s4272_s7, %s5111_s26 }
  0x33   : > { %s4281_s22 = scalar_lea.hbm %s5112_s23, %s3092_s9  ;;  %p3827_p7 = scmp.ne.s32.totalorder %s4272_s7, %s3826_s14 }
  0x34   : > { %p3833_p12 = scmp.lt.u32.totalorder %s3831_s4, %s3826_s14  ;;  %p3835_p1 = scmp.lt.u32.totalorder %s3826_s14, %s4272_s7 }
  0x35   : > { %p3829_p9 = pnand %p4289_p8, %p3827_p7 }
  0x36   : > { %p3834_p13 = por %p3833_p12, %p3832_p11 }
  0x37   : > { %p3830_p10 = pneg %p3829_p9 }
  0x38   : > { %p3836_p2 = por %p3835_p1, %p3834_p13 }
  0x3a   : > { %p3837_p4 = pnand %p3836_p2, %p3830_p10 }
  0x3c   : > { %3840 = shalt.err (!%p3837_p4)
}
  0x3d   : > { %s3841_s27 = scalar_lea.vmem %s4276_s1, 128  ;;  %s4080_s9 = smov [#allocation5]  }
  0x3e   : > { %p3842_p5 = scmp.ne.s32.totalorder %s4276_s1, %s3841_s27  ;;  %s3846_s0 = sshll.u32 %s4080_s9, 4  ;;  %s3847_s0 = int_to_ptr.vmem [resolvable:$false] %s3846_s0 }
  0x3f   : > { %s3848_s3 = scalar_lea.vmem %s3847_s0, 256  ;;  %p3849_p3 = scmp.lt.s32.totalorder %s4276_s1, %s3847_s0 }
  0x40   : > { %p3844_p7 = pnand %p3842_p5, %p4289_p8  ;;  %p3850_p0 = scmp.lt.s32.totalorder %s3848_s3, %s3841_s27 }
  0x42   : > { %p3845_p9 = pneg %p3844_p7  ;;  %p3851_p11 = por %p3850_p0, %p3849_p3 }
  0x44   : > { %p3852_p12 = pnand %p3851_p11, %p3845_p9 }
  0x46   : > { %3855 = shalt.err (!%p3852_p12)
}
  0x47   : > { %3729 = dma.hbm_to_vmem [thread:$0]  (!%p4264_p6), %s4272_s7, 128, %s4276_s1, %s4283_s16  }
  0x48   : > { %s4314_s14 = sadd.s32 4294967295, %s4078_s30   ;;  %s5059_s4 = sadd.s32 4294967294, %s4078_s30  }
  0x49   : > { %p69_p0 = scmp.ne.s32.totalorder %s4070_s2, %s4066_s29  ;;  %p5071_p3 = scmp.eq.s32.totalorder %s4314_s14, 0 }
  0x4a   : > { %p565_p10 = scmp.eq.s32.totalorder %s4314_s14, 1  ;;  %p571_p13 = scmp.eq.s32.totalorder %s5059_s4, 1 }
  0x4b   : > { %p4325_p1 = por %p5071_p3, %p69_p0  ;;  %p3086_p2 = scmp.ge.s32.totalorder %s4078_s30, 1 }
  0x4c   : > { %p5115_p4 = scmp.ne.s32.totalorder %s4074_s6, %s4070_s2  ;;  %p4337_p7 = por %p571_p13, %p69_p0 }
  0x4d   : > { %s5114_s24 = scalar_select %p4325_p1, 1, 0 }
  0x4e   : > { %p4333_p5 = por %p565_p10, %p5115_p4  ;;  %p630_p9 = scmp.lt.s32.totalorder %s4078_s30, 3 }
  0x4f   : > { %s5118_s1 = scalar_select %p4337_p7, 1, 0 }
  0x50   : > { %s5116_s7 = scalar_select %p4333_p5, 1, 0 }
  0x51   : > { %5119 = sst [smem:[#allocation25_spill]] %s5118_s1  ;;  %p4342_p11 = pnand %p3086_p2, %p630_p9 }
  0x52   : > { %5117 = sst [smem:[#allocation24_spill]] %s5116_s7  ;;  %s4081_s27 = smov [#allocation8]  }
  0x53   : > { %s5120_s25 = scalar_select %p4342_p11, 1, 0 }
  0x54   : > { %s648_s9 = sshll.u32 %s4081_s27, 4  ;;  %p3719_p12 = pneg %p4342_p11  ;;  %s4346_s9 = int_to_ptr.vmem [resolvable:$true] %s648_s9 }
  0x55   : > { %s3089_s0 = sshll.u32 %s4260_s8, 2  ;;  %s3090_s3 = sshll.u32 %s4078_s30, 6 }
  0x56   : > { %p4354_p10 = pnand %p3719_p12, %p5071_p3  ;;  %s5122_s1 = sld [smem:[#allocation26_spill]] }
  0x57   : > { %s717_s7 = scalar_lea.vmem [#allocation2], %s3089_s0  ;;  %s5123_s21 = sld [smem:[#allocation31_spill]] }
  0x58   : > { %s724_s20 = sshll.u32 %s717_s7, 4  ;;  %p3858_p13 = pneg %p4354_p10  ;;  %s4363_s20 = int_to_ptr.vmem [resolvable:$true] %s724_s20 }
  0x5c   : > { %s4361_s29 = scalar_lea.hbm %s5122_s1, %s3090_s3 }
  0x5d   : > { %s3856_s19 = scalar_lea.hbm %s5123_s21, 256 }
  0x5e   : > { %p3857_p0 = scmp.ne.s32.totalorder %s5123_s21, %s3856_s19  ;;  %p3863_p9 = scmp.lt.u32.totalorder %s3856_s19, %s5123_s21 }
  0x60   : > { %p3859_p2 = pnand %p3858_p13, %p3857_p0 }
  0x62   : > { %p3860_p4 = pneg %p3859_p2 }
  0x64   : > { %p3865_p12 = pnand %p3863_p9, %p3860_p4 }
  0x66   : > { %3868 = shalt.err (!%p3865_p12)
}
  0x67   : > { %s3869_s7 = scalar_lea.vmem %s4346_s9, 256  ;;  %p3877_p1 = scmp.lt.s32.totalorder %s4346_s9, %s4346_s9 }
  0x68   : > { %p3870_p3 = scmp.ne.s32.totalorder %s4346_s9, %s3869_s7  ;;  %p3878_p11 = scmp.lt.s32.totalorder %s3869_s7, %s3869_s7 }
  0x6a   : > { %p3872_p7 = pnand %p3870_p3, %p3858_p13  ;;  %p3879_p6 = por %p3878_p11, %p3877_p1 }
  0x6c   : > { %p3873_p5 = pneg %p3872_p7 }
  0x6e   : > { %p3880_p8 = pnand %p3879_p6, %p3873_p5 }
  0x70   : > { %3883 = shalt.err (!%p3880_p8)
}
  0x71   : > { %s4082_s17 = smov 64   ;;  %s4083_s18 = smov 4  }
  0x72   : > { %3722 = dma.hbm_to_vmem [thread:$0]  (!%p4354_p10), %s5123_s21, 256, %s4346_s9, [#allocation9], %s4082_s17, %s4082_s17, %s4083_s18  }
  0x73   : > { %s714_s0 = scalar_lea.sflag [#allocation3], %s4260_s8  ;;  %s3884_s3 = scalar_lea.hbm %s4361_s29, 64 }
  0x74   : > { %p3885_p3 = scmp.ne.s32.totalorder %s4361_s29, %s3884_s3  ;;  %p5124_p6 = scmp.ne.s32.totalorder %s5113_s5, 0 }
  0x75   : > { %s3889_s26 = scalar_lea.hbm %s5122_s1, 128  ;;  %p3890_p5 = scmp.lt.u32.totalorder %s4361_s29, %s5122_s1 }
  0x76   : > { %p3887_p8 = pnand %p3885_p3, %p5124_p6  ;;  %p3891_p7 = scmp.lt.u32.totalorder %s3889_s26, %s3884_s3 }
  0x77   : > { %p3893_p0 = scmp.lt.u32.totalorder %s3884_s3, %s4361_s29 }
  0x78   : > { %p3888_p1 = pneg %p3887_p8  ;;  %p3892_p11 = por %p3891_p7, %p3890_p5 }
  0x7a   : > { %p3894_p13 = por %p3893_p0, %p3892_p11 }
  0x7c   : > { %p3895_p2 = pnand %p3894_p13, %p3888_p1 }
  0x7e   : > { %3898 = shalt.err (!%p3895_p2)
}
  0x7f   : > { %s3899_s4 = scalar_lea.vmem %s4363_s20, 64  ;;  %s4084_s9 = smov [#allocation2]  }
  0x80   : > { %p3900_p10 = scmp.ne.s32.totalorder %s4363_s20, %s3899_s4  ;;  %s3904_s17 = sshll.u32 %s4084_s9, 4  ;;  %s3905_s17 = int_to_ptr.vmem [resolvable:$false] %s3904_s17 }
  0x81   : > { %s3906_s12 = scalar_lea.vmem %s3905_s17, 128  ;;  %p3907_p12 = scmp.lt.s32.totalorder %s4363_s20, %s3905_s17 }
  0x82   : > { %p3902_p4 = pnand %p3900_p10, %p5124_p6  ;;  %p3908_p3 = scmp.lt.s32.totalorder %s3906_s12, %s3899_s4 }
  0x84   : > { %p3903_p9 = pneg %p3902_p4  ;;  %p3909_p8 = por %p3908_p3, %p3907_p12 }
  0x86   : > { %p3910_p5 = pnand %p3909_p8, %p3903_p9 }
  0x88   : > { %3913 = shalt.err (!%p3910_p5)
}
  0x89   : > { %p5125_p1 = scmp.ne.s32.totalorder %s5110_s28, 0  ;;  %s5126_s18 = sshll.u32 %s4260_s8, 3 }
  0x8a   : > { %s753_s19 = scalar_lea.vmem [#allocation7], %s5126_s18  ;;  %s3914_s3 = scalar_lea.hbm %s4281_s22, 128 }
  0x8b   : > { %3726 = dma.hbm_to_vmem [thread:$0]  (!%p5125_p1), %s4361_s29, 64, %s4363_s20, %s714_s0  }
  0x8c   : > { %s760_s30 = sshll.u32 %s753_s19, 4  ;;  %p3915_p7 = scmp.ne.s32.totalorder %s4281_s22, %s3914_s3  ;;  %s761_s30 = int_to_ptr.vmem [resolvable:$true] %s760_s30 }
  0x8d   : > { %s3919_s26 = scalar_lea.hbm %s5112_s23, 256  ;;  %p3920_p13 = scmp.lt.u32.totalorder %s4281_s22, %s5112_s23 }
  0x8e   : > { %p3917_p11 = pnand %p3915_p7, %p5124_p6  ;;  %p3921_p2 = scmp.lt.u32.totalorder %s3919_s26, %s3914_s3 }
  0x8f   : > { %p3923_p4 = scmp.lt.u32.totalorder %s3914_s3, %s4281_s22 }
  0x90   : > { %p3918_p0 = pneg %p3917_p11  ;;  %p3922_p10 = por %p3921_p2, %p3920_p13 }
  0x92   : > { %p3924_p9 = por %p3923_p4, %p3922_p10 }
  0x94   : > { %p3925_p12 = pnand %p3924_p9, %p3918_p0 }
  0x96   : > { %3928 = shalt.err (!%p3925_p12)
}
  0x97   : > { %s3929_s20 = scalar_lea.vmem %s761_s30, 128  ;;  %s4085_s29 = smov [#allocation7]  }
  0x98   : > { %p3930_p3 = scmp.ne.s32.totalorder %s761_s30, %s3929_s20  ;;  %s3934_s8 = sshll.u32 %s4085_s29, 4  ;;  %s3935_s8 = int_to_ptr.vmem [resolvable:$false] %s3934_s8 }
  0x99   : > { %s3936_s0 = scalar_lea.vmem %s3935_s8, 256  ;;  %p3937_p7 = scmp.lt.s32.totalorder %s761_s30, %s3935_s8 }
  0x9a   : > { %p3932_p8 = pnand %p3930_p3, %p5124_p6  ;;  %p3938_p11 = scmp.lt.s32.totalorder %s3936_s0, %s3929_s20 }
  0x9c   : > { %p3933_p5 = pneg %p3932_p8  ;;  %p3939_p1 = por %p3938_p11, %p3937_p7 }
  0x9e   : > { %p3940_p2 = pnand %p3939_p1, %p3933_p5 }
  0xa0   : > { %3943 = shalt.err (!%p3940_p2)
}
  0xa1   : > { %p5127_p13 = scmp.ne.s32.totalorder %s5110_s28, 0  ;;  %p5128_p0 = scmp.ne.s32.totalorder %s5120_s25, 0 }
  0xa2   : > { %s4431_s5 = sand.u32 (!%p5128_p0), 1, %s4070_s2   ;;  %p5129_p6 = scmp.ne.s32.totalorder (!%p5128_p0), %s5114_s24, 0 }
  0xa3   : > { %3732 = dma.hbm_to_vmem [thread:$0]  (!%p5127_p13), %s4281_s22, 128, %s761_s30, %s4283_s16  }
  0xa4   : > { %769 = sbr.rel (%p5128_p0) target bundleno = 3399 (0xd47), region = 112  ;;  %s3096_s9 = sshll.u32 (!%p5128_p0), %s4431_s5, 2 }
  0xa5   : > { %s772_s17 = scalar_lea.sflag (!%p5128_p0), [#allocation3], %s4431_s5  ;;  %s4435_s12 = scalar_lea.vmem (!%p5128_p0), [#allocation2], %s3096_s9 }
  0xab   : > { %4045 = dma.done.wait (%p5129_p6), %s772_s17, 64  }
  0xac   : > { %4047 = vsyncadd (%p5129_p6), %s772_s17, 4294967232  ;;  %s5079_s16 = sand.u32 1, %s4314_s14   ;;  %s4443_s22 = sshll.u32 %s4431_s5, 3 }
  0xad   : > { %s781_s28 = scalar_lea.sflag [#allocation6], %s5079_s16  ;;  %s784_s25 = scalar_lea.vmem [#allocation5], %s4443_s22 }
  0xae   : > { %4049 = dma.done.wait (%p5129_p6), %s781_s28, 256  }
  0xaf   : > { %4051 = vsyncadd (%p5129_p6), %s781_s28, 4294967040  ;;  %s793_s18 = scalar_lea.vmem [#allocation7], %s4443_s22  ;;  %p5130_p1 = scmp.eq.s32.totalorder %s4314_s14, 0 }
  0xb1   : > { %4053 = dma.done.wait (%p5130_p1), [#allocation9], 256   ;;  %p5131_p10 = pmov %p5130_p1 }
  0xb2   : > { %v4086_v0 = vmov 0.0   ;;  %vm4087_vm0 = vmmov 0   ;;  %s5132_s30 = sld [smem:[#allocation29_spill]]  ;;  %v3787_v3 = vld [vmem:[#allocation8] sm:$0xff]   ;;  %v3789_v4 = vld [vmem:[#allocation8 + $0x8] sm:$0xff]   ;;  %v4471_v5 = vld [vmem:[%s793_s18] sm:$0xff]  ;;  %v1125_v44 = vlaneseq }
  0xb3   : > { %4055 = vsyncadd (%p5131_p10), [#allocation9], 4294967040  ;;  %3317 = vmatprep.subr.bf16.mxu1 %v4086_v0  ;;  %3309 = vmatprep.subr.bf16.mxu0 %v4086_v0  ;;  %vm933_vm1 = vcmask 261120   ;;  %v916_v8 = vpack.c.bf16 %v4471_v5, %v4471_v5  ;;  %vm1004_vm2 = vcmask 1045504   ;;  %vm886_vm3 = vcmask 326656   ;;  %s5134_s0 = sld [smem:[#allocation30_spill]] }
  0xb4   : > { %3313 = vmatprep.mubr.msk.bf16.mxu0 %vm4087_vm0, %v4086_v0  ;;  %3325 = vmatprep.mubr.msk.bf16.mxu1 %vm4087_vm0, %v4086_v0  ;;  %vm1000_vm4 = vcmask 490496   ;;  %vm1072_vm5 = vcmask 1043456   ;;  %v4491_v11 = vld [vmem:[%s784_s25] sm:$0xff]  ;;  %v906_v16 = vld [vmem:[%s4435_s12] sm:$0xf]  ;;  %v4515_v45 = vand.u32 127, %v1125_v44 }
  0xb5   : > { %3310 = vmatpush3.bf16.msra.mxu0 %v3787_v3  ;;  %v887_v13 = vsel %vm886_vm3, %v4491_v11, 0.0  ;;  %s5135_s24 = sld [smem:[#allocation32_spill]]  ;;  %vm1132_vm7 = vcmask 523264   ;;  %s5136_s27 = sld [smem:[#allocation35_spill]] }
  0xb6   : > { %3311 = vmatprep.subr.bf16.mxu0 %v4086_v0  ;;  %v888_v15 = vrot.slane %v887_v13, 4  ;;  %vm1127_vm6 = vcmp.ge.s32.totalorder %v4515_v45, 32  ;;  %s5137_s17 = sld [smem:[#allocation33_spill]]  ;;  %s5138_s12 = sld [smem:[#allocation34_spill]] }
  0xb7   : > { %s5139_s7 = sld [smem:[#allocation36_spill]]  ;;  %s5140_s29 = sld [smem:[#allocation39_spill]] }
  0xb8   : > { %s5133_s3 = smov %s5132_s30  ;;  %v3785_v1 = vld [vmem:[%s5132_s30] sm:$0xff]   ;;  %v889_v17 = vadd.f32 %v888_v15, %v887_v13  ;;  %s5142_s28 = sld [smem:[#allocation41_spill]] }
  0xb9   : > { %v3786_v2 = vld [vmem:[%s5133_s3 + $0x8] sm:$0xff]   ;;  %3318 = vmatpush3.bf16.msra.mxu1 %v3785_v1  ;;  %v3788_v6 = vld [vmem:[%s5133_s3 + $0x10] sm:$0xff]   ;;  %v3790_v7 = vld [vmem:[%s5133_s3 + $0x18] sm:$0x3f]   ;;  %3312 = vmatpush3.bf16.msra.mxu0 %v3789_v4  ;;  %s5143_s18 = sld [smem:[#allocation43_spill]]  ;;  %s5146_s19 = sld [smem:[#allocation37_spill]] }
  0xba   : > { %3319 = vmatprep.subr.bf16.mxu1 %v4086_v0  ;;  %v3791_v9 = vld [vmem:[%s5134_s0] sm:$0xff]   ;;  %3329 = vmatprep.subr.bf16.mxu0 %v4086_v0  ;;  %v3793_v10 = vld [vmem:[%s5134_s0 + $0x10] ss:$0 sps:$4 sm:$0xff]   ;;  %v1006_v12 = vsel %vm1004_vm2, %v3790_v7, 0  ;;  %v3792_v14 = vld [vmem:[%s5134_s0 + $0x8] sm:$0xff]   ;;  %v890_v19 = vrot.slane %v889_v17, 2 }
  0xbb   : > { %v1074_v18 = vsel %vm1072_vm5, %v3793_v10, 0  ;;  %v3115_v47 = vld [vmem:[%s5135_s24] ss:$0 sm:$0xff]  ;;  %v3795_v7 = vld [vmem:[%s5136_s27 + $0x8] sm:$0xff]   ;;  %s5147_s26 = sld [smem:[#allocation38_spill]]  ;;  %s5148_s20 = sld [smem:[#allocation44_spill]] }
  0xbc   : > { %3314 = vmatmul.mubr.msk.bf16.vlgmr.msra.gmra.mrb[0].mxu0 %vm933_vm1, %v916_v8  ;;  %v891_v20 = vadd.f32 %v890_v19, %v889_v17  ;;  %v3796_v8 = vld [vmem:[%s5136_s27 + $0x10] sm:$0xff]   ;;  %v3116_v17 = vld [vmem:[%s5137_s17] ss:$0 sm:$0xff]  ;;  %s5080_s30 = scalar_lea.vmem [#allocation13], %s4443_s22  ;;  %s4899_s4 = sshll.u32 %s4314_s14, 7 }
  0xbd   : > { %3320 = vmatpush3.bf16.msra.mxu1 %v3786_v2  ;;  %3330 = vmatpush3.bf16.msra.mxu0 %v3791_v9  ;;  %v3797_v9 = vld [vmem:[%s5136_s27 + $0x18] sm:$0xff]   ;;  %v3117_v19 = vld [vmem:[%s5138_s12] ss:$0 sm:$0xff]  ;;  %s5141_s8 = smov %s5140_s29  ;;  %s5145_s12 = sld [smem:[#allocation42_spill]] }
  0xbe   : > { %3321 = vmatprep.subr.bf16.mxu1 %v4086_v0  ;;  %3335 = vmatprep.mubr.msk.bf16.mxu0 %vm4087_vm0, %v4086_v0  ;;  %v892_v21 = vrot.slane %v891_v20, 1  ;;  %v3806_v45 = vld [vmem:[%s5140_s29] sm:$0xff]   ;;  %s5144_s29 = sld [smem:[#allocation40_spill]]  ;;  %s5150_s17 = sld [smem:[#allocation45_spill]] }
  0xbf   : > { %3331 = vmatprep.subr.bf16.mxu0 %v4086_v0  ;;  %s2852_s24 = scalar_lea.sflag [#allocation4], %s4431_s5 }
  0xc0   : > { %v893_v22 = vadd.f32 %v892_v21, %v891_v20 }
  0xc1   : > { %3322 = vmatpush3.bf16.msra.mxu1 %v3788_v6  ;;  %3332 = vmatpush3.bf16.msra.mxu0 %v3792_v14  ;;  %v3794_v6 = vld [vmem:[%s5136_s27] sm:$0xff]  }
  0xc2   : > { %3323 = vmatprep.subr.bf16.mxu1 %v4086_v0  ;;  %3333 = vmatprep.subr.bf16.mxu0 %v4086_v0  ;;  %v895_v23 = vmul.f32 0.125, %v893_v22 }
  0xc4   : > { %v896_v24 = vsub.f32 %v4491_v11, %v895_v23 }
  0xc5   : > { %3324 = vmatpush3.bf16.msra.mxu1 %v1006_v12  ;;  %3334 = vmatpush3.bf16.msra.mxu0 %v1074_v18 }
  0xc6   : > { %3339 = vmatprep.subr.bf16.mxu1 %v4086_v0  ;;  %3351 = vmatprep.subr.bf16.mxu0 %v4086_v0  ;;  %v897_v25 = vmul.f32 %v896_v24, %v896_v24 }
  0xc8   : > { %3326 = vmatmul.mubr.msk.bf16.vlgmr.msra.gmra.mrb[0].mxu1 %vm1000_vm4, %v906_v16  ;;  %v898_v26 = vsel %vm886_vm3, %v897_v25, 0.0  ;;  %v3118_v25 = vld [vmem:[%s5028_s10] ss:$0 sm:$0xff] }
  0xc9   : > { %3347 = vmatprep.mubr.msk.bf16.mxu1 %vm4087_vm0, %v4086_v0  ;;  %v899_v27 = vrot.slane %v898_v26, 4  ;;  %3340 = vmatpush3.bf16.msra.mxu1 %v3794_v6  ;;  %v3807_v6 = vld [vmem:[%s5142_s28] sm:$0xff]  }
  0xca   : > { %3341 = vmatprep.subr.bf16.mxu1 %v4086_v0 }
  0xcb   : > { %v900_v28 = vadd.f32 %v899_v27, %v898_v26 }
  0xcd   : > { %v901_v29 = vrot.slane %v900_v28, 2  ;;  %3342 = vmatpush3.bf16.msra.mxu1 %v3795_v7 }
  0xce   : > { %3343 = vmatprep.subr.bf16.mxu1 %v4086_v0 }
  0xcf   : > { %v902_v30 = vadd.f32 %v901_v29, %v900_v28 }
  0xd1   : > { %v903_v31 = vrot.slane %v902_v30, 1  ;;  %3344 = vmatpush3.bf16.msra.mxu1 %v3796_v8  ;;  %v3808_v8 = vld [vmem:[%s5141_s8 + $0x8] sm:$0xff]  }
  0xd2   : > { %3345 = vmatprep.subr.bf16.mxu1 %v4086_v0 }
  0xd3   : > { %v904_v32 = vadd.f32 %v903_v31, %v902_v30 }
  0xd5   : > { %v905_v33 = vmul.f32 0.14285715, %v904_v32  ;;  %3346 = vmatpush3.bf16.msra.mxu1 %v3797_v9  ;;  %v3809_v9 = vld [vmem:[%s5142_s28 + $0x8] sm:$0xff]  }
  0xd6   : > { %3363 = vmatprep.subr.bf16.mxu1 %v4086_v0 }
  0xd7   : > { %v1048_v34 = vpack.c.bf16 %v905_v33, %v905_v33 }
  0xd9   : > { %3336 = vmatmul.mubr.msk.bf16.vlgmr.msra.gmra.mrb[4].mxu0 %vm886_vm3, %v1048_v34 }
  0xda   : > { %3359 = vmatprep.mubr.msk.bf16.mxu0 %vm4087_vm0, %v4086_v0 }
 0x18f   : > { %v971_v35 = vpop.f32.mrb[0].mxu0 }
 0x190   : > { %v3315_v36 = vpop.f32.mrb[1].mxu0 }
 0x191   : > { %v974_v37 = vpop.f32.mrb[2].mxu0 }
 0x192   : > { %v3316_v38 = vpop.f32.mrb[3].mxu0 }
 0x19b   : > { %v1042_v39 = vpop.f32.mrb[0].mxu1 }
 0x19c   : > { %v1043_v40 = vadd.f32 %v1042_v39, %v971_v35  ;;  %v3327_v41 = vpop.f32.mrb[1].mxu1 }
 0x19d   : > { %v1045_v42 = vpop.f32.mrb[2].mxu1 }
 0x19e   : > { %v3328_v43 = vpop.f32.mrb[3].mxu1 }
 0x1ac   : > { %v1110_v46 = vpop.f32.mrb[4].mxu0 }
 0x1ad   : > { %v1116_v48 = vadd.f32 %v1110_v46, %v1043_v40  ;;  %v3337_v49 = vpop.f32.mrb[5].mxu0 }
 0x1ae   : > { %v1113_v50 = vpop.f32.mrb[6].mxu0  ;;  %v3800_v49 = vld [vmem:[%s5031_s13 + $0x8] sm:$0xff]  }
 0x1af   : > { %v1124_v51 = vadd.f32 %v3115_v47, %v1116_v48  ;;  %v3338_v52 = vpop.f32.mrb[7].mxu0  ;;  %v3798_v47 = vld [vmem:[%s5031_s13] sm:$0xff]   ;;  %v3801_v50 = vld [vmem:[%s5033_s15 + $0x8] sm:$0xff]  }
 0x1b0   : > { %v3799_v48 = vld [vmem:[%s5033_s15] sm:$0xff]   ;;  %3352 = vmatpush3.bf16.msra.mxu0 %v3798_v47  ;;  %v3803_v52 = vld [vmem:[%s5033_s15 + $0x10] sm:$0xff]  }
 0x1b1   : > { %v1131_v53 = vsel %vm1127_vm6, %v1124_v51, 0.0  ;;  %v1130_v55 = vsel %vm1127_vm6, 0.0, %v1124_v51  ;;  %3353 = vmatprep.subr.bf16.mxu0 %v4086_v0 }
 0x1b2   : > { %v1133_v54 = vsel %vm1132_vm7, %v1131_v53, 0.0  ;;  %v1136_v56 = vsel %vm1132_vm7, %v1130_v55, 0.0  ;;  %v3804_v53 = vld [vmem:[%s5031_s13 + $0x18] sm:$0xff]  }
 0x1b3   : > { %1134 = vadd.xlane.f32.xlu0 %v1133_v54  ;;  %v3805_v54 = vld [vmem:[%s5033_s15 + $0x18] sm:$0xff]  }
 0x1b4   : > { %3354 = vmatpush3.bf16.msra.mxu0 %v3800_v49 }
 0x1b5   : > { %3355 = vmatprep.subr.bf16.mxu0 %v4086_v0 }
 0x1b7   : > { %1137 = vadd.xlane.f32.xlu0 %v1136_v56 }
 0x240   : > { %v1135_v57 = vpop.xlane.xlu0 %1134 }
 0x244   : > { %v1138_v58 = vpop.xlane.xlu0 %1137 }
 0x245   : > { %v1139_v59 = vsel %vm1127_vm6, %v1135_v57, %v1138_v58 }
 0x246   : > { %v1140_v60 = vmul.f32 0.03125, %v1139_v59 }
 0x248   : > { %v1141_v61 = vsub.f32 %v1124_v51, %v1140_v60  ;;  %v3802_v51 = vld [vmem:[%s5031_s13 + $0x10] sm:$0xff]  }
 0x249   : > { %3356 = vmatpush3.bf16.msra.mxu0 %v3802_v51  ;;  %v3132_v51 = vld [vmem:[%s5147_s26] ss:$0 sm:$0xff]  ;;  %s4089_s26 = smov [#allocation10]  }
 0x24a   : > { %v1143_v62 = vsel %vm1127_vm6, %v1141_v61, 0.0  ;;  %v1142_v63 = vsel %vm1127_vm6, 0.0, %v1141_v61  ;;  %3357 = vmatprep.subr.bf16.mxu0 %v4086_v0  ;;  %s3948_s16 = sshll.u32 %s4089_s26, 4  ;;  %s3949_s16 = int_to_ptr.vmem [resolvable:$false] %s3948_s16 }
 0x24b   : > { %v1144_v1 = vmul.f32 %v1143_v62, %v1143_v62  ;;  %v1148_v3 = vmul.f32 %v1142_v63, %v1142_v63  ;;  %v3125_v63 = vld [vmem:[%s5139_s7] ss:$0 sm:$0xff]  ;;  %s5149_s7 = sld [smem:[#allocation24_spill]] }
 0x24d   : > { %v1145_v2 = vsel %vm1132_vm7, %v1144_v1, 0.0  ;;  %v1149_v4 = vsel %vm1132_vm7, %v1148_v3, 0.0  ;;  %3358 = vmatpush3.bf16.msra.mxu0 %v3804_v53  ;;  %v1643_v53 = vld [vmem:[%s5148_s20 + $0x8] sm:$0xff] }
 0x24e   : > { %1146 = vadd.xlane.f32.xlu1 %v1145_v2  ;;  %3375 = vmatprep.subr.bf16.mxu0 %v4086_v0 }
 0x251   : > { %p5151_p9 = scmp.ne.s32.totalorder %s5149_s7, 0 }
 0x252   : > { %1150 = vadd.xlane.f32.xlu1 %v1149_v4 }
 0x2db   : > { %v1147_v10 = vpop.xlane.xlu1 %1146 }
 0x2df   : > { %v1151_v12 = vpop.xlane.xlu1 %1150 }
 0x2e0   : > { %v1152_v13 = vsel %vm1127_vm6, %v1147_v10, %v1151_v12  ;;  %v3810_v10 = vld [vmem:[%s5141_s8 + $0x10] sm:$0xff]  }
 0x2e1   : > { %v1153_v14 = vmul.f32 0.03125, %v1152_v13  ;;  %v3811_v12 = vld [vmem:[%s5142_s28 + $0x10] sm:$0xff]   ;;  %v3812_v13 = vld [vmem:[%s5141_s8 + $0x18] sm:$0xff]  }
 0x2e3   : > { %v1154_v15 = vadd.f32 1e-05, %v1153_v14  ;;  %v3813_v14 = vld [vmem:[%s5142_s28 + $0x18] sm:$0xff]  }
 0x2e5   : > { %3814 = vrsqrt.f32 %v1154_v15  ;;  %v1637_v15 = vld [vmem:[%s5143_s18] sm:$0xff] }
 0x2ef   : > { %v3815_v16 = vpop.eup %3814 }
 0x2f0   : > { %v1156_v18 = vmul.f32 %v3815_v16, %v1141_v61  ;;  %v3124_v61 = vld [vmem:[%s5029_s11] ss:$0 sm:$0xff]  ;;  %v1638_v16 = vld [vmem:[%s5143_s18 + $0x8] sm:$0xff] }
 0x2f2   : > { %v1163_v20 = vmul.f32 %v3116_v17, %v1156_v18  ;;  %v4667_v17 = vpack.c.bf16 %v1638_v16, %v1637_v15  ;;  %v4088_v18 = vmov 0.0|0.0  }
 0x2f4   : > { %v1170_v21 = vadd.f32 %v3117_v19, %v1163_v20  ;;  %v1639_v19 = vld [vmem:[%s5143_s18 + $0x10] sm:$0xff]  ;;  %v1640_v20 = vld [vmem:[%s5143_s18 + $0x18] sm:$0xff] }
 0x2f6   : > { %v1171_v22 = vmul.f32 0.01, %v1170_v21 }
 0x2f8   : > { %v1172_v23 = vmax.f32 %v1170_v21, %v1171_v22  ;;  %v4681_v21 = vpack.c.bf16 %v1640_v20, %v1639_v19  ;;  %v4690_v22 = vld [vmem:[%s5143_s18 + $0x20] sm:$0xff] }
 0x2fa   : > { %v1173_v24 = vpack.c.bf16 %v1172_v23, %v1172_v23 }
 0x2fc   : > { %3348 = vmatmul.mubr.msk.bf16.vlgmr.msra.gmra.mrb[4].mxu1 %vm1132_vm7, %v1173_v24 }
 0x2fd   : > { %3371 = vmatprep.mubr.msk.bf16.mxu1 %vm4087_vm0, %v4086_v0  ;;  %3364 = vmatpush3.bf16.msra.mxu1 %v3799_v48 }
 0x2fe   : > { %3365 = vmatprep.subr.bf16.mxu1 %v4086_v0 }
 0x301   : > { %3366 = vmatpush3.bf16.msra.mxu1 %v3801_v50  ;;  %v3126_v50 = vld [vmem:[%s5146_s19] ss:$0 sm:$0xff]  ;;  %s869_s19 = scalar_lea.vmem [#allocation10], %s4443_s22 }
 0x302   : > { %3367 = vmatprep.subr.bf16.mxu1 %v4086_v0  ;;  %s2875_s25 = sshll.u32 %s869_s19, 4  ;;  %s2876_s25 = int_to_ptr.vmem [resolvable:$true] %s2875_s25 }
 0x303   : > { %s3944_s6 = scalar_lea.vmem %s2876_s25, 128  ;;  %p3951_p8 = scmp.lt.s32.totalorder %s2876_s25, %s3949_s16 }
 0x304   : > { %p3945_p4 = scmp.ne.s32.totalorder %s2876_s25, %s3944_s6 }
 0x305   : > { %3368 = vmatpush3.bf16.msra.mxu1 %v3803_v52  ;;  %v1642_v52 = vld [vmem:[%s5148_s20] sm:$0xff] }
 0x306   : > { %3369 = vmatprep.subr.bf16.mxu1 %v4086_v0  ;;  %p3946_p12 = pnand %p3945_p4, %p5151_p9 }
 0x308   : > { %p3947_p3 = pneg %p3946_p12 }
 0x309   : > { %3370 = vmatpush3.bf16.msra.mxu1 %v3805_v54 }
 0x30a   : > { %3387 = vmatprep.subr.bf16.mxu1 %v4086_v0 }
 0x3cf   : > { %v1250_v26 = vpop.f32.mrb[4].mxu1 }
 0x3d0   : > { %v1251_v27 = vadd.f32 %v3118_v25, %v1250_v26  ;;  %v3349_v28 = vpop.f32.mrb[5].mxu1 }
 0x3d1   : > { %v1253_v29 = vpop.f32.mrb[6].mxu1 }
 0x3d2   : > { %v3350_v30 = vpop.f32.mrb[7].mxu1  ;;  %v1259_v31 = vsel %vm1127_vm6, %v1251_v27, 0.0  ;;  %v1258_v32 = vsel %vm1127_vm6, 0.0, %v1251_v27 }
 0x3d3   : > { %v1260_v33 = vsel %vm1132_vm7, %v1259_v31, 0.0  ;;  %v1263_v34 = vsel %vm1132_vm7, %v1258_v32, 0.0  ;;  %v3138_v31 = vld [vmem:[%s5144_s29] ss:$0 sm:$0xff] }
 0x3d4   : > { %1261 = vadd.xlane.f32.xlu0 %v1260_v33  ;;  %1264 = vadd.xlane.f32.xlu1 %v1263_v34  ;;  %v3145_v32 = vld [vmem:[%s5145_s12] ss:$0 sm:$0xff]  ;;  %s4905_s12 = scalar_lea.hbm %s5150_s17, %s4899_s4 }
 0x461   : > { %v1262_v35 = vpop.xlane.xlu0 %1261  ;;  %v1265_v36 = vpop.xlane.xlu1 %1264 }
 0x462   : > { %v1266_v37 = vsel %vm1127_vm6, %v1262_v35, %v1265_v36 }
 0x463   : > { %v1267_v38 = vmul.f32 0.03125, %v1266_v37 }
 0x465   : > { %v1268_v39 = vsub.f32 %v1251_v27, %v1267_v38 }
 0x467   : > { %v1270_v40 = vsel %vm1127_vm6, %v1268_v39, 0.0  ;;  %v1269_v41 = vsel %vm1127_vm6, 0.0, %v1268_v39 }
 0x468   : > { %v1271_v42 = vmul.f32 %v1270_v40, %v1270_v40  ;;  %v1275_v43 = vmul.f32 %v1269_v41, %v1269_v41 }
 0x46a   : > { %v1272_v44 = vsel %vm1132_vm7, %v1271_v42, 0.0  ;;  %v1276_v46 = vsel %vm1132_vm7, %v1275_v43, 0.0 }
 0x46b   : > { %1273 = vadd.xlane.f32.xlu0 %v1272_v44  ;;  %1277 = vadd.xlane.f32.xlu1 %v1276_v46 }
 0x4f8   : > { %v1274_v55 = vpop.xlane.xlu0 %1273  ;;  %v1278_v56 = vpop.xlane.xlu1 %1277 }
 0x4f9   : > { %v1279_v57 = vsel %vm1127_vm6, %v1274_v55, %v1278_v56 }
 0x4fa   : > { %v1280_v58 = vmul.f32 0.03125, %v1279_v57 }
 0x4fc   : > { %v1281_v59 = vadd.f32 1e-05, %v1280_v58 }
 0x4fe   : > { %3816 = vrsqrt.f32 %v1281_v59 }
 0x508   : > { %v3817_v60 = vpop.eup %3816 }
 0x509   : > { %v1283_v62 = vmul.f32 %v3817_v60, %v1268_v39  ;;  %v4716_v60 = vpack.c.bf16 %v1643_v53, %v1642_v52 }
 0x50b   : > { %v1290_v1 = vmul.f32 %v3124_v61, %v1283_v62  ;;  %v1644_v62 = vld [vmem:[%s5148_s20 + $0x10] sm:$0xff] }
 0x50d   : > { %v1297_v2 = vadd.f32 %v3125_v63, %v1290_v1  ;;  %v1645_v63 = vld [vmem:[%s5148_s20 + $0x18] sm:$0xff] }
 0x50f   : > { %v1298_v3 = vmul.f32 0.01, %v1297_v2 }
 0x511   : > { %v1299_v4 = vmax.f32 %v1297_v2, %v1298_v3 }
 0x513   : > { %v1300_v7 = vpack.c.bf16 %v1299_v4, %v1299_v4 }
 0x515   : > { %3360 = vmatmul.mubr.msk.bf16.vlgmr.msra.gmra.mrb[8].mxu0 %vm1132_vm7, %v1300_v7  ;;  %3372 = vmatmul.mubr.msk.bf16.vlgmr.msra.gmra.mrb[8].mxu1 %vm1132_vm7, %v1300_v7 }
 0x516   : > { %3376 = vmatpush3.bf16.msra.mxu0 %v3806_v45  ;;  %3388 = vmatpush3.bf16.msra.mxu1 %v3807_v6 }
 0x517   : > { %3377 = vmatprep.subr.bf16.mxu0 %v4086_v0  ;;  %3389 = vmatprep.subr.bf16.mxu1 %v4086_v0 }
 0x518   : > { %3383 = vmatprep.mubr.msk.bf16.mxu0 %vm4087_vm0, %v4086_v0  ;;  %3395 = vmatprep.mubr.msk.bf16.mxu1 %vm4087_vm0, %v4086_v0 }
 0x51a   : > { %3378 = vmatpush3.bf16.msra.mxu0 %v3808_v8  ;;  %3390 = vmatpush3.bf16.msra.mxu1 %v3809_v9 }
 0x51b   : > { %3379 = vmatprep.subr.bf16.mxu0 %v4086_v0  ;;  %3391 = vmatprep.subr.bf16.mxu1 %v4086_v0 }
 0x51e   : > { %3380 = vmatpush3.bf16.msra.mxu0 %v3810_v10  ;;  %3392 = vmatpush3.bf16.msra.mxu1 %v3811_v12 }
 0x51f   : > { %3381 = vmatprep.subr.bf16.mxu0 %v4086_v0  ;;  %3393 = vmatprep.subr.bf16.mxu1 %v4086_v0 }
 0x522   : > { %3382 = vmatpush3.bf16.msra.mxu0 %v3812_v13  ;;  %3394 = vmatpush3.bf16.msra.mxu1 %v3813_v14 }
 0x523   : > { %3607 = vmatprep.subr.bf16.mxu0 %v4088_v18  ;;  %3619 = vmatprep.subr.bf16.mxu1 %v4088_v18 }
 0x525   : > { %3384 = vmatmul.mubr.msk.bf16.vlgmr.msra.gmra.mrb[12].mxu0 %vm1132_vm7, %v1300_v7  ;;  %3396 = vmatmul.mubr.msk.bf16.vlgmr.msra.gmra.mrb[12].mxu1 %vm1132_vm7, %v1300_v7 }
 0x526   : > { %3409 = vmatprep.mubr.msk.f32.mxu0 %vm4087_vm0, %v4086_v0  ;;  %3435 = vmatprep.mubr.msk.f32.mxu1 %vm4087_vm0, %v4086_v0 }
 0x527   : > { %3609 = vmatpush3.bf16.msra.mxu0 %v4667_v17  ;;  %3621 = vmatpush3.bf16.msra.mxu1 %v4667_v17 }
 0x528   : > { %3610 = vmatprep.subr.bf16.mxu0 %v4088_v18  ;;  %3622 = vmatprep.subr.bf16.mxu1 %v4088_v18 }
 0x52b   : > { %3612 = vmatpush3.bf16.msra.mxu0 %v4681_v21  ;;  %3624 = vmatpush3.bf16.msra.mxu1 %v4681_v21 }
 0x52c   : > { %3407 = vmatprep.subr.mxu0 %v4086_v0  ;;  %3433 = vmatprep.subr.mxu1 %v4086_v0 }
 0x52f   : > { %3408 = vmatpush3.msra.mxu0 %v4690_v22  ;;  %3434 = vmatpush3.msra.mxu1 %v4690_v22 }
 0x530   : > { %3613 = vmatprep.subr.bf16.mxu0 %v4088_v18  ;;  %3631 = vmatprep.subr.bf16.mxu1 %v4088_v18 }
 0x5e8   : > { %v1377_v23 = vpop.f32.mrb[8].mxu0  ;;  %v1456_v24 = vpop.f32.mrb[8].mxu1 }
 0x5e9   : > { %v3361_v25 = vpop.f32.mrb[9].mxu0  ;;  %v3373_v26 = vpop.f32.mrb[9].mxu1  ;;  %v1378_v56 = vadd.f32 %v3126_v50, %v1377_v23  ;;  %v1457_v58 = vadd.f32 %v3132_v51, %v1456_v24 }
 0x5ea   : > { %v1380_v27 = vpop.f32.mrb[10].mxu0  ;;  %v1459_v28 = vpop.f32.mrb[10].mxu1 }
 0x5eb   : > { %v3362_v29 = vpop.f32.mrb[11].mxu0  ;;  %v3374_v30 = vpop.f32.mrb[11].mxu1 }
 0x5f8   : > { %v1535_v33 = vpop.f32.mrb[12].mxu0  ;;  %v1620_v34 = vpop.f32.mrb[12].mxu1 }
 0x5f9   : > { %v1536_v35 = vadd.f32 %v3138_v31, %v1535_v33  ;;  %v1621_v36 = vadd.f32 %v3145_v32, %v1620_v34  ;;  %v3385_v37 = vpop.f32.mrb[13].mxu0  ;;  %v3397_v38 = vpop.f32.mrb[13].mxu1 }
 0x5fa   : > { %v1538_v39 = vpop.f32.mrb[14].mxu0  ;;  %v1623_v40 = vpop.f32.mrb[14].mxu1 }
 0x5fb   : > { %v3144_v41 = vmul.f32 -1.442695, %v1536_v35  ;;  %v3151_v42 = vmul.f32 -1.442695, %v1621_v36  ;;  %v3386_v43 = vpop.f32.mrb[15].mxu0  ;;  %v3398_v44 = vpop.f32.mrb[15].mxu1 }
 0x5fd   : > { %3818 = vpow2.f32 %v3144_v41 }
 0x5fe   : > { %3820 = vpow2.f32 %v3151_v42 }
 0x607   : > { %v3819_v46 = vpop.eup %3818 }
 0x608   : > { %v3821_v47 = vpop.eup %3820  ;;  %v1544_v48 = vadd.f32 1.0, %v3819_v46 }
 0x609   : > { %v1629_v49 = vadd.f32 1.0, %v3821_v47 }
 0x60a   : > { %3822 = vrcp.f32 %v1544_v48 }
 0x60b   : > { %3824 = vrcp.f32 %v1629_v49 }
 0x614   : > { %v3823_v54 = vpop.eup %3822 }
 0x615   : > { %v3825_v55 = vpop.eup %3824  ;;  %v1635_v57 = vmul.f32 %v3823_v54, %v4491_v11  ;;  %v4748_v11 = vld [vmem:[%s5148_s20 + $0x20] sm:$0xff] }
 0x616   : > { %v1632_v59 = vmul.f32 %v3825_v55, %v4471_v5  ;;  %v4734_v5 = vpack.c.bf16 %v1645_v63, %v1644_v62 }
 0x617   : > { %v4718_v61 = vadd.f32 %v1635_v57, %v1378_v56 }
 0x618   : > { %v1633_v1 = vadd.f32 %v1632_v59, %v1457_v58 }
 0x619   : > { %3410 = vmatmul.mubr.msk.f32.vlgmr.msra.gmra.mrb[16].mxu0 %vm886_vm3, %v4718_v61  ;;  %2849 = vst.msk [vmem:[%s869_s19] sm:$0xff] %vm886_vm3, %v4718_v61 }
 0x61a   : > { %3615 = vmatpush3.bf16.msra.mxu0 %v4716_v60  ;;  %3422 = vmatprep.mubr.msk.f32.mxu0 %vm4087_vm0, %v4086_v0  ;;  %1634 = vst.msk [vmem:[%s5080_s30] sm:$0xff] %vm933_vm1, %v1633_v1  ;;  %s3950_s30 = scalar_lea.vmem %s3949_s16, 256 }
 0x61b   : > { %3616 = vmatprep.subr.bf16.mxu0 %v4088_v18  ;;  %p3952_p5 = scmp.lt.s32.totalorder %s3950_s30, %s3944_s6 }
 0x61d   : > { %p3953_p7 = por %p3952_p5, %p3951_p8 }
 0x61e   : > { %3618 = vmatpush3.bf16.msra.mxu0 %v4734_v5 }
 0x61f   : > { %3420 = vmatprep.subr.mxu0 %v4086_v0  ;;  %p3954_p11 = pnand %p3953_p7, %p3947_p3 }
 0x622   : > { %3421 = vmatpush3.msra.mxu0 %v4748_v11 }
 0x623   : > { %3423 = vmatmul.mubr.msk.f32.vlgmr.msra.gmra.mrb[18].mxu0 %vm886_vm3, %v4718_v61  ;;  %3625 = vmatprep.subr.bf16.mxu0 %v4088_v18 }
 0x624   : > { %3627 = vmatpush3.bf16.msra.mxu0 %v4716_v60  ;;  %3448 = vmatprep.mubr.msk.f32.mxu0 %vm4087_vm0, %v4086_v0 }
 0x625   : > { %3628 = vmatprep.subr.bf16.mxu0 %v4088_v18 }
 0x628   : > { %3630 = vmatpush3.bf16.msra.mxu0 %v4734_v5 }
 0x629   : > { %3446 = vmatprep.subr.mxu0 %v4086_v0 }
 0x62c   : > { %3447 = vmatpush3.msra.mxu0 %v4748_v11 }
 0x62d   : > { %3637 = vmatprep.subr.bf16.mxu0 %v4088_v18 }
 0x6ec   : > { %v1716_v2 = vpop.f32.mrb[16].mxu0 }
 0x6ed   : > { %v3411_v3 = vpop.f32.mrb[17].mxu0 }
 0x6f6   : > { %v1786_v4 = vpop.f32.mrb[18].mxu0 }
 0x6f7   : > { %v1790_v45 = vmul.f32 %v1786_v4, %v1716_v2  ;;  %v3424_v6 = vpop.f32.mrb[19].mxu0 }
 0x6f9   : > { %v1791_v7 = vsub.f32 %v1790_v45, %v4718_v61 }
 0x6fb   : > { %v4763_v8 = vadd.f32 8.0, %v1791_v7 }
 0x6fd   : > { %v1793_v9 = vmul.f32 0.05, %v4763_v8  ;;  %v1942_v24 = vmul.f32 0.33333334, %v4763_v8 }
 0x6ff   : > { %v1794_v10 = vmul.f32 0.33333334, %v1793_v9 }
 0x701   : > { %v1795_v12 = vadd.f32 %v1794_v10, %v4718_v61 }
 0x703   : > { %3436 = vmatmul.mubr.msk.f32.vlgmr.msra.gmra.mrb[16].mxu1 %vm886_vm3, %v1795_v12  ;;  %3449 = vmatmul.mubr.msk.f32.vlgmr.msra.gmra.mrb[20].mxu0 %vm886_vm3, %v1795_v12 }
 0x704   : > { %3633 = vmatpush3.bf16.msra.mxu1 %v4667_v17  ;;  %3639 = vmatpush3.bf16.msra.mxu0 %v4716_v60 }
 0x705   : > { %3634 = vmatprep.subr.bf16.mxu1 %v4088_v18  ;;  %3640 = vmatprep.subr.bf16.mxu0 %v4088_v18 }
 0x706   : > { %3461 = vmatprep.mubr.msk.f32.mxu1 %vm4087_vm0, %v4086_v0  ;;  %3474 = vmatprep.mubr.msk.f32.mxu0 %vm4087_vm0, %v4086_v0 }
 0x708   : > { %3636 = vmatpush3.bf16.msra.mxu1 %v4681_v21  ;;  %3642 = vmatpush3.bf16.msra.mxu0 %v4734_v5 }
 0x709   : > { %3459 = vmatprep.subr.mxu1 %v4086_v0  ;;  %3472 = vmatprep.subr.mxu0 %v4086_v0 }
 0x70c   : > { %3460 = vmatpush3.msra.mxu1 %v4690_v22  ;;  %3473 = vmatpush3.msra.mxu0 %v4748_v11 }
 0x70d   : > { %3643 = vmatprep.subr.bf16.mxu1 %v4088_v18  ;;  %3649 = vmatprep.subr.bf16.mxu0 %v4088_v18 }
 0x7d6   : > { %v1865_v13 = vpop.f32.mrb[16].mxu1  ;;  %v1935_v14 = vpop.f32.mrb[20].mxu0 }
 0x7d7   : > { %v1939_v15 = vmul.f32 %v1935_v14, %v1865_v13  ;;  %v3437_v16 = vpop.f32.mrb[17].mxu1  ;;  %v3450_v19 = vpop.f32.mrb[21].mxu0 }
 0x7d9   : > { %v1940_v20 = vsub.f32 %v1939_v15, %v1795_v12 }
 0x7db   : > { %v1941_v23 = vadd.f32 8.0, %v1940_v20 }
 0x7dd   : > { %v1943_v25 = vsub.f32 %v1941_v23, %v1942_v24  ;;  %v2092_v35 = vsub.f32 %v4763_v8, %v1941_v23 }
 0x7df   : > { %v1944_v26 = vmul.f32 0.05, %v1943_v25 }
 0x7e1   : > { %v1945_v27 = vadd.f32 %v1944_v26, %v4718_v61 }
 0x7e3   : > { %3462 = vmatmul.mubr.msk.f32.vlgmr.msra.gmra.mrb[18].mxu1 %vm886_vm3, %v1945_v27  ;;  %3475 = vmatmul.mubr.msk.f32.vlgmr.msra.gmra.mrb[22].mxu0 %vm886_vm3, %v1945_v27 }
 0x7e4   : > { %3645 = vmatpush3.bf16.msra.mxu1 %v4667_v17  ;;  %3651 = vmatpush3.bf16.msra.mxu0 %v4716_v60 }
 0x7e5   : > { %3646 = vmatprep.subr.bf16.mxu1 %v4088_v18  ;;  %3652 = vmatprep.subr.bf16.mxu0 %v4088_v18 }
 0x7e6   : > { %3487 = vmatprep.mubr.msk.f32.mxu1 %vm4087_vm0, %v4086_v0  ;;  %3500 = vmatprep.mubr.msk.f32.mxu0 %vm4087_vm0, %v4086_v0 }
 0x7e8   : > { %3648 = vmatpush3.bf16.msra.mxu1 %v4681_v21  ;;  %3654 = vmatpush3.bf16.msra.mxu0 %v4734_v5 }
 0x7e9   : > { %3485 = vmatprep.subr.mxu1 %v4086_v0  ;;  %3498 = vmatprep.subr.mxu0 %v4086_v0 }
 0x7ec   : > { %3486 = vmatpush3.msra.mxu1 %v4690_v22  ;;  %3499 = vmatpush3.msra.mxu0 %v4748_v11 }
 0x7ed   : > { %3655 = vmatprep.subr.bf16.mxu1 %v4088_v18  ;;  %3661 = vmatprep.subr.bf16.mxu0 %v4088_v18 }
 0x8b6   : > { %v2015_v28 = vpop.f32.mrb[18].mxu1  ;;  %v2085_v29 = vpop.f32.mrb[22].mxu0 }
 0x8b7   : > { %v2089_v30 = vmul.f32 %v2085_v29, %v2015_v28  ;;  %v3463_v31 = vpop.f32.mrb[19].mxu1  ;;  %v3476_v32 = vpop.f32.mrb[23].mxu0 }
 0x8b9   : > { %v2090_v33 = vsub.f32 %v2089_v30, %v1945_v27 }
 0x8bb   : > { %v2091_v34 = vadd.f32 8.0, %v2090_v33 }
 0x8bd   : > { %v2093_v36 = vadd.f32 %v2092_v35, %v2091_v34  ;;  %v2242_v39 = vadd.f32 %v2091_v34, %v1941_v23 }
 0x8bf   : > { %v2094_v37 = vmul.f32 0.05, %v2093_v36  ;;  %v2243_v42 = vmul.f32 3.0, %v2242_v39 }
 0x8c1   : > { %v2095_v38 = vadd.f32 %v2094_v37, %v4718_v61  ;;  %v2244_v49 = vadd.f32 %v2243_v42, %v4763_v8 }
 0x8c3   : > { %3488 = vmatmul.mubr.msk.f32.vlgmr.msra.gmra.mrb[20].mxu1 %vm886_vm3, %v2095_v38  ;;  %3501 = vmatmul.mubr.msk.f32.vlgmr.msra.gmra.mrb[24].mxu0 %vm886_vm3, %v2095_v38 }
 0x8c4   : > { %3657 = vmatpush3.bf16.msra.mxu1 %v4667_v17  ;;  %3663 = vmatpush3.bf16.msra.mxu0 %v4716_v60 }
 0x8c5   : > { %3658 = vmatprep.subr.bf16.mxu1 %v4088_v18  ;;  %3664 = vmatprep.subr.bf16.mxu0 %v4088_v18 }
 0x8c6   : > { %3513 = vmatprep.mubr.msk.f32.mxu1 %vm4087_vm0, %v4086_v0  ;;  %3526 = vmatprep.mubr.msk.f32.mxu0 %vm4087_vm0, %v4086_v0 }
 0x8c8   : > { %3660 = vmatpush3.bf16.msra.mxu1 %v4681_v21  ;;  %3666 = vmatpush3.bf16.msra.mxu0 %v4734_v5 }
 0x8c9   : > { %3511 = vmatprep.subr.mxu1 %v4086_v0  ;;  %3524 = vmatprep.subr.mxu0 %v4086_v0 }
 0x8cc   : > { %3512 = vmatpush3.msra.mxu1 %v4690_v22  ;;  %3525 = vmatpush3.msra.mxu0 %v4748_v11 }
 0x8cd   : > { %3667 = vmatprep.subr.bf16.mxu1 %v4088_v18  ;;  %3673 = vmatprep.subr.bf16.mxu0 %v4088_v18 }
 0x996   : > { %v2165_v40 = vpop.f32.mrb[20].mxu1  ;;  %v2235_v41 = vpop.f32.mrb[24].mxu0 }
 0x997   : > { %v2239_v43 = vmul.f32 %v2235_v41, %v2165_v40  ;;  %v3489_v44 = vpop.f32.mrb[21].mxu1  ;;  %v3502_v46 = vpop.f32.mrb[25].mxu0 }
 0x999   : > { %v2240_v47 = vsub.f32 %v2239_v43, %v2095_v38 }
 0x99b   : > { %v2241_v48 = vadd.f32 8.0, %v2240_v47 }
 0x99d   : > { %v2245_v50 = vadd.f32 %v2244_v49, %v2241_v48 }
 0x99f   : > { %v2246_v51 = vmul.f32 0.00625, %v2245_v50 }
 0x9a1   : > { %v4827_v52 = vadd.f32 %v2246_v51, %v4718_v61 }
 0x9a3   : > { %3514 = vmatmul.mubr.msk.f32.vlgmr.msra.gmra.mrb[22].mxu1 %vm886_vm3, %v4827_v52  ;;  %3527 = vmatmul.mubr.msk.f32.vlgmr.msra.gmra.mrb[26].mxu0 %vm886_vm3, %v4827_v52 }
 0x9a4   : > { %3669 = vmatpush3.bf16.msra.mxu1 %v4667_v17  ;;  %3675 = vmatpush3.bf16.msra.mxu0 %v4716_v60 }
 0x9a5   : > { %3670 = vmatprep.subr.bf16.mxu1 %v4088_v18  ;;  %3676 = vmatprep.subr.bf16.mxu0 %v4088_v18 }
 0x9a6   : > { %3539 = vmatprep.mubr.msk.f32.mxu1 %vm4087_vm0, %v4086_v0  ;;  %3552 = vmatprep.mubr.msk.f32.mxu0 %vm4087_vm0, %v4086_v0 }
 0x9a8   : > { %3672 = vmatpush3.bf16.msra.mxu1 %v4681_v21  ;;  %3678 = vmatpush3.bf16.msra.mxu0 %v4734_v5 }
 0x9a9   : > { %3537 = vmatprep.subr.mxu1 %v4086_v0  ;;  %3550 = vmatprep.subr.mxu0 %v4086_v0 }
 0x9ac   : > { %3538 = vmatpush3.msra.mxu1 %v4690_v22  ;;  %3551 = vmatpush3.msra.mxu0 %v4748_v11 }
 0x9ad   : > { %3679 = vmatprep.subr.bf16.mxu1 %v4088_v18  ;;  %3685 = vmatprep.subr.bf16.mxu0 %v4088_v18 }
 0xa76   : > { %v2317_v53 = vpop.f32.mrb[22].mxu1  ;;  %v2387_v54 = vpop.f32.mrb[26].mxu0 }
 0xa77   : > { %v2391_v55 = vmul.f32 %v2387_v54, %v2317_v53  ;;  %v3515_v56 = vpop.f32.mrb[23].mxu1  ;;  %v3528_v57 = vpop.f32.mrb[27].mxu0 }
 0xa79   : > { %v2392_v58 = vsub.f32 %v2391_v55, %v4827_v52 }
 0xa7b   : > { %v4850_v59 = vadd.f32 8.0, %v2392_v58 }
 0xa7d   : > { %v2394_v61 = vmul.f32 0.05, %v4850_v59  ;;  %v2543_v8 = vmul.f32 0.33333334, %v4850_v59 }
 0xa7f   : > { %v2395_v62 = vmul.f32 0.33333334, %v2394_v61 }
 0xa81   : > { %v2396_v63 = vadd.f32 %v2395_v62, %v4827_v52 }
 0xa83   : > { %3540 = vmatmul.mubr.msk.f32.vlgmr.msra.gmra.mrb[24].mxu1 %vm886_vm3, %v2396_v63  ;;  %3553 = vmatmul.mubr.msk.f32.vlgmr.msra.gmra.mrb[28].mxu0 %vm886_vm3, %v2396_v63 }
 0xa84   : > { %3681 = vmatpush3.bf16.msra.mxu1 %v4667_v17  ;;  %3687 = vmatpush3.bf16.msra.mxu0 %v4716_v60 }
 0xa85   : > { %3682 = vmatprep.subr.bf16.mxu1 %v4088_v18  ;;  %3688 = vmatprep.subr.bf16.mxu0 %v4088_v18 }
 0xa86   : > { %3565 = vmatprep.mubr.msk.f32.mxu1 %vm4087_vm0, %v4086_v0  ;;  %3578 = vmatprep.mubr.msk.f32.mxu0 %vm4087_vm0, %v4086_v0 }
 0xa88   : > { %3684 = vmatpush3.bf16.msra.mxu1 %v4681_v21  ;;  %3690 = vmatpush3.bf16.msra.mxu0 %v4734_v5 }
 0xa89   : > { %3563 = vmatprep.subr.mxu1 %v4086_v0  ;;  %3576 = vmatprep.subr.mxu0 %v4086_v0 }
 0xa8c   : > { %3564 = vmatpush3.msra.mxu1 %v4690_v22  ;;  %3577 = vmatpush3.msra.mxu0 %v4748_v11 }
 0xa8d   : > { %3691 = vmatprep.subr.bf16.mxu1 %v4088_v18  ;;  %3697 = vmatprep.subr.bf16.mxu0 %v4088_v18 }
 0xb56   : > { %v2466_v1 = vpop.f32.mrb[24].mxu1  ;;  %v2536_v2 = vpop.f32.mrb[28].mxu0 }
 0xb57   : > { %v2540_v3 = vmul.f32 %v2536_v2, %v2466_v1  ;;  %v3541_v4 = vpop.f32.mrb[25].mxu1  ;;  %v3554_v45 = vpop.f32.mrb[29].mxu0 }
 0xb59   : > { %v2541_v6 = vsub.f32 %v2540_v3, %v2396_v63 }
 0xb5b   : > { %v4872_v7 = vadd.f32 8.0, %v2541_v6 }
 0xb5d   : > { %v2544_v9 = vsub.f32 %v4872_v7, %v2543_v8 }
 0xb5f   : > { %v2545_v10 = vmul.f32 0.05, %v2544_v9 }
 0xb61   : > { %v2546_v12 = vadd.f32 %v2545_v10, %v4827_v52 }
 0xb63   : > { %3566 = vmatmul.mubr.msk.f32.vlgmr.msra.gmra.mrb[26].mxu1 %vm886_vm3, %v2546_v12  ;;  %3579 = vmatmul.mubr.msk.f32.vlgmr.msra.gmra.mrb[30].mxu0 %vm886_vm3, %v2546_v12 }
 0xb64   : > { %3693 = vmatpush3.bf16.msra.mxu1 %v4667_v17  ;;  %3699 = vmatpush3.bf16.msra.mxu0 %v4716_v60 }
 0xb65   : > { %3694 = vmatprep.subr.bf16.mxu1 %v4088_v18  ;;  %3700 = vmatprep.subr.bf16.mxu0 %v4088_v18 }
 0xb66   : > { %3591 = vmatprep.mubr.msk.f32.mxu1 %vm4087_vm0, %v4086_v0  ;;  %3604 = vmatprep.mubr.msk.f32.mxu0 %vm4087_vm0, %v4086_v0 }
 0xb68   : > { %3696 = vmatpush3.bf16.msra.mxu1 %v4681_v21  ;;  %3702 = vmatpush3.bf16.msra.mxu0 %v4734_v5  ;;  %v2693_v5 = vsub.f32 %v4850_v59, %v4872_v7 }
 0xb69   : > { %3589 = vmatprep.subr.mxu1 %v4086_v0  ;;  %3602 = vmatprep.subr.mxu0 %v4086_v0 }
 0xb6c   : > { %3590 = vmatpush3.msra.mxu1 %v4690_v22  ;;  %3603 = vmatpush3.msra.mxu0 %v4748_v11 }
 0xc36   : > { %v2616_v17 = vpop.f32.mrb[26].mxu1  ;;  %v2686_v18 = vpop.f32.mrb[30].mxu0 }
 0xc37   : > { %v2690_v60 = vmul.f32 %v2686_v18, %v2616_v17  ;;  %v3567_v13 = vpop.f32.mrb[27].mxu1  ;;  %v3580_v14 = vpop.f32.mrb[31].mxu0 }
 0xc39   : > { %v2691_v21 = vsub.f32 %v2690_v60, %v2546_v12 }
 0xc3b   : > { %v2692_v15 = vadd.f32 8.0, %v2691_v21 }
 0xc3d   : > { %v2694_v16 = vadd.f32 %v2693_v5, %v2692_v15 }
 0xc3f   : > { %v2695_v0 = vmul.f32 0.05, %v2694_v16 }
 0xc41   : > { %v2696_v19 = vadd.f32 %v2695_v0, %v4827_v52 }
 0xc43   : > { %3592 = vmatmul.mubr.msk.f32.vlgmr.msra.gmra.mrb[28].mxu1 %vm886_vm3, %v2696_v19  ;;  %3605 = vmatmul.mubr.msk.f32.vlgmr.msra.gmra.mrb[32].mxu0 %vm886_vm3, %v2696_v19 }
 0xc44   : > { %3957 = shalt.err (!%p3954_p11)
}
 0xc45   : > { %s3958_s5 = scalar_lea.hbm %s4905_s12, 128  ;;  %s3962_s9 = scalar_lea.hbm %s5150_s17, 256 }
 0xc46   : > { %p3959_p2 = scmp.ne.s32.totalorder %s4905_s12, %s3958_s5  ;;  %p3963_p6 = scmp.lt.u32.totalorder %s4905_s12, %s5150_s17 }
 0xc47   : > { %p3964_p1 = scmp.lt.u32.totalorder %s3962_s9, %s3958_s5  ;;  %p3966_p4 = scmp.lt.u32.totalorder %s3958_s5, %s4905_s12 }
 0xc48   : > { %p3960_p13 = pnand %p3959_p2, %p5151_p9 }
 0xc49   : > { %p3965_p10 = por %p3964_p1, %p3963_p6 }
 0xc4a   : > { %p3961_p0 = pneg %p3960_p13 }
 0xc4b   : > { %p3967_p12 = por %p3966_p4, %p3965_p10 }
 0xc4d   : > { %p3968_p3 = pnand %p3967_p12, %p3961_p0 }
 0xc4f   : > { %3971 = shalt.err (!%p3968_p3)
}
 0xc50   : > { %3713 = dma.vmem_to_hbm [thread:$0]  (%p5151_p9), %s2876_s25, 128, %s4905_s12, %s2852_s24   ;;  %v2843_v22 = vadd.f32 %v2692_v15, %v4872_v7 }
 0xc51   : > { %s876_s30 = scalar_lea.vmem [#allocation11], %s4443_s22  ;;  %s5152_s12 = scalar_lea.vmem [#allocation13], %s4443_s22 }
 0xc52   : > { %v2844_v23 = vmul.f32 3.0, %v2843_v22  ;;  %s2888_s6 = sshll.u32 %s876_s30, 4  ;;  %s2901_s25 = sshll.u32 %s5152_s12, 4  ;;  %s4939_s6 = int_to_ptr.vmem [resolvable:$true] %s2888_s6  ;;  %s4947_s25 = int_to_ptr.vmem [resolvable:$true] %s2901_s25 }
 0xc53   : > { %s5153_s19 = sld [smem:[#allocation46_spill]]  ;;  %s5154_s16 = sld [smem:[#allocation47_spill]] }
 0xc54   : > { %v2845_v29 = vadd.f32 %v2844_v23, %v4850_v59  ;;  %s5155_s22 = sand.u32 1, %s4314_s14   ;;  %s3972_s24 = scalar_lea.vmem %s4939_s6, 128 }
 0xc55   : > { %s4952_s12 = scalar_lea.sflag [#allocation12], %s5155_s22  ;;  %p3973_p8 = scmp.ne.s32.totalorder %s4939_s6, %s3972_s24 }
 0xc56   : > { %s4090_s5 = smov [#allocation11]  }
 0xc57   : > { %p3974_p5 = pnand %p3973_p8, %p5151_p9  ;;  %s3976_s1 = sshll.u32 %s4090_s5, 4  ;;  %s3977_s1 = int_to_ptr.vmem [resolvable:$false] %s3976_s1 }
 0xc58   : > { %s3978_s9 = scalar_lea.vmem %s3977_s1, 256  ;;  %p3979_p11 = scmp.lt.s32.totalorder %s4939_s6, %s3977_s1 }
 0xc59   : > { %s4937_s29 = scalar_lea.hbm %s5153_s19, %s4899_s4  ;;  %s4945_s0 = scalar_lea.hbm %s5154_s16, %s4899_s4 }
 0xc5a   : > { %p3975_p7 = pneg %p3974_p5  ;;  %p3980_p2 = scmp.lt.s32.totalorder %s3978_s9, %s3972_s24 }
 0xc5c   : > { %p3981_p13 = por %p3980_p2, %p3979_p11 }
 0xc5e   : > { %p3982_p0 = pnand %p3981_p13, %p3975_p7 }
 0xd16   : > { %v2766_v11 = vpop.f32.mrb[28].mxu1  ;;  %v2836_v20 = vpop.f32.mrb[32].mxu0 }
 0xd17   : > { %v2840_v24 = vmul.f32 %v2836_v20, %v2766_v11  ;;  %v3593_v25 = vpop.f32.mrb[29].mxu1  ;;  %v3606_v26 = vpop.f32.mrb[33].mxu0 }
 0xd19   : > { %v2841_v27 = vsub.f32 %v2840_v24, %v2696_v19 }
 0xd1b   : > { %v2842_v28 = vadd.f32 8.0, %v2841_v27 }
 0xd1d   : > { %v2846_v30 = vadd.f32 %v2845_v29, %v2842_v28 }
 0xd1f   : > { %v2847_v31 = vmul.f32 0.00625, %v2846_v30 }
 0xd21   : > { %v2848_v32 = vadd.f32 %v2847_v31, %v4827_v52 }
 0xd23   : > { %2850 = vst.msk [vmem:[%s876_s30] sm:$0xff] %vm886_vm3, %v2848_v32 }
 0xd24   : > { %3985 = shalt.err (!%p3982_p0)
}
 0xd25   : > { %s3986_s14 = scalar_lea.hbm %s4937_s29, 128  ;;  %s3990_s26 = scalar_lea.hbm %s5153_s19, 256 }
 0xd26   : > { %p3987_p6 = scmp.ne.s32.totalorder %s4937_s29, %s3986_s14  ;;  %p3991_p4 = scmp.lt.u32.totalorder %s4937_s29, %s5153_s19 }
 0xd27   : > { %p3992_p12 = scmp.lt.u32.totalorder %s3990_s26, %s3986_s14  ;;  %p3994_p8 = scmp.lt.u32.totalorder %s3986_s14, %s4937_s29 }
 0xd28   : > { %p3988_p1 = pnand %p3987_p6, %p5151_p9 }
 0xd29   : > { %p3993_p3 = por %p3992_p12, %p3991_p4 }
 0xd2a   : > { %p3989_p10 = pneg %p3988_p1 }
 0xd2b   : > { %p3995_p5 = por %p3994_p8, %p3993_p3 }
 0xd2d   : > { %p3996_p7 = pnand %p3995_p5, %p3989_p10 }
 0xd2f   : > { %3999 = shalt.err (!%p3996_p7)
}
 0xd30   : > { %3714 = dma.vmem_to_hbm [thread:$0]  (%p5151_p9), %s4939_s6, 128, %s4937_s29, %s4952_s12  }
 0xd31   : > { %s4000_s24 = scalar_lea.vmem %s4947_s25, 128  ;;  %s4091_s5 = smov [#allocation13]  }
 0xd32   : > { %p4001_p11 = scmp.ne.s32.totalorder %s4947_s25, %s4000_s24  ;;  %s4004_s9 = sshll.u32 %s4091_s5, 4  ;;  %s4005_s9 = int_to_ptr.vmem [resolvable:$false] %s4004_s9 }
 0xd33   : > { %s4006_s14 = scalar_lea.vmem %s4005_s9, 256  ;;  %p4007_p0 = scmp.lt.s32.totalorder %s4947_s25, %s4005_s9 }
 0xd34   : > { %p4002_p2 = pnand %p4001_p11, %p5151_p9  ;;  %p4008_p6 = scmp.lt.s32.totalorder %s4006_s14, %s4000_s24 }
 0xd36   : > { %p4003_p13 = pneg %p4002_p2  ;;  %p4009_p1 = por %p4008_p6, %p4007_p0 }
 0xd38   : > { %p4010_p10 = pnand %p4009_p1, %p4003_p13 }
 0xd3a   : > { %4013 = shalt.err (!%p4010_p10)
}
 0xd3b   : > { %s4014_s6 = scalar_lea.hbm %s4945_s0, 128  ;;  %s4018_s30 = scalar_lea.hbm %s5154_s16, 256 }
 0xd3c   : > { %p4015_p4 = scmp.ne.s32.totalorder %s4945_s0, %s4014_s6  ;;  %p4019_p8 = scmp.lt.u32.totalorder %s4945_s0, %s5154_s16 }
 0xd3d   : > { %p4020_p5 = scmp.lt.u32.totalorder %s4018_s30, %s4014_s6  ;;  %p4022_p11 = scmp.lt.u32.totalorder %s4014_s6, %s4945_s0 }
 0xd3e   : > { %p4016_p12 = pnand %p4015_p4, %p5151_p9 }
 0xd3f   : > { %p4021_p7 = por %p4020_p5, %p4019_p8 }
 0xd40   : > { %p4017_p3 = pneg %p4016_p12 }
 0xd41   : > { %p4023_p2 = por %p4022_p11, %p4021_p7 }
 0xd43   : > { %p4024_p13 = pnand %p4023_p2, %p4017_p3 }
 0xd45   : > { %4027 = shalt.err (!%p4024_p13)
}
 0xd46   : > { %3715 = dma.vmem_to_hbm [thread:$0]  (%p5151_p9), %s4947_s25, 128, %s4945_s0, %s4952_s12  }
 0xd47 PF: > { %s5156_s1 = sld [smem:[#allocation19_spill]]  ;;  %s5157_s24 = sld [smem:[#allocation25_spill]] }
 0xd48   : > { %s5158_s5 = sld [smem:[#allocation21_spill]] }
 0xd4d   : > { %s2913_s9 = sand.u32 1, %s5156_s1   ;;  %p5159_p0 = scmp.ne.s32.totalorder %s5157_s24, 0 }
 0xd4e   : > { %p5160_p6 = scmp.ge.s32.totalorder %s5158_s5, 2  ;;  %s2914_s14 = scalar_lea.sflag [#allocation4], %s2913_s9 }
 0xd50   : > { %p3734_p1 = pnand %p5160_p6, %p5159_p0 }
 0xd52   : > { %4057 = dma.done.wait (!%p3734_p1), %s2914_s14, 128  }
 0xd53   : > { %4059 = vsyncadd (!%p3734_p1), %s2914_s14, 4294967168  ;;  %s5161_s6 = sadd.s32 4294967294, %s5158_s5  }
 0xd54   : > { %s2922_s29 = sand.u32 1, %s5161_s6  }
 0xd55   : > { %s2923_s4 = scalar_lea.sflag [#allocation12], %s2922_s29 }
 0xd56   : > { %4061 = dma.done.wait (!%p3734_p1), %s2923_s4, 256  }
 0xd57   : > { %4063 = vsyncadd (!%p3734_p1), %s2923_s4, 4294967040  ;;  %s5162_s30 = sld [smem:[#allocation22_spill]]  ;;  %s5163_s0 = sld [smem:[#allocation20_spill]] }
 0xd58   : > { %s5164_s6 = sld [smem:[#allocation23_spill]]  ;;  %s5165_s29 = smov %s4070_s2 }
 0xd5d   : > { %p46_p9 = scmp.ge.s32.totalorder %s5162_s30, 4   ;;  %s5166_s2 = smov %s5163_s0 }
 0xd5f   :  { %48 = sbr.rel (!%p46_p9) target bundleno = 33 (0x21), region = 217 }
 0xd66   :  { %2937 = vsyncpa [#allocation3], 1 }
 0xd67   :  { %2939 = vsyncpa [#allocation3 + $0x1], 1 }
 0xd68   :  { %2940 = vsyncpa [#allocation6], 1 }
 0xd69   :  { %2942 = vsyncpa [#allocation6 + $0x1], 1 }
 0xd6a   :  { %2943 = vsyncpa [#allocation9], 1 }
 0xd6b   :  { %2944 = vsyncpa [#allocation4], 1 }
 0xd6c   :  { %2946 = vsyncpa [#allocation4 + $0x1], 1 }
 0xd6d   :  { %2947 = vsyncpa [#allocation12], 1 }
 0xd6e   :  { %2949 = vsyncpa [#allocation12 + $0x1], 1 }

</bundles_post_ra>
